<compile_context>
chip_gen: v7x
topology: tpu7x:2x2x1
jax: 0.10.0
libtpu: 0.0.40
codegen_flags: <defaults>
</compile_context>

<pallas_src>
import functools

import jax
import jax.numpy as jnp
from jax.experimental import pallas as pl
from jax.experimental.pallas import tpu as pltpu

LANE = 128   # vreg lane width
SUB = 8      # vreg sublane count


def _round_up(n, m):
    return ((n + m - 1) // m) * m


def _pad2(a, rows, cols):
    a = jnp.asarray(a, jnp.float32)
    if a.ndim == 1:
        a = a.reshape(1, -1)
    out = jnp.zeros((rows, cols), jnp.float32)
    return out.at[: a.shape[0], : a.shape[1]].set(a)


def _vmem():
    return pl.BlockSpec(memory_space=pltpu.MemorySpace.VMEM)


# ---------------------------------------------------------------------------
# One fused kernel for the whole forward pass (everything stays in VMEM).
# ---------------------------------------------------------------------------
def _cheb_model_kernel(x_ref, s_ref, pool_ref, mol_ref,
                       c1w0_ref, c1w1_ref, c1b_ref,
                       c2w0_ref, c2w1_ref, c2b_ref,
                       glw_ref, glb_ref,
                       m1w_ref, m1b_ref, m2w_ref, m2b_ref, m3w_ref, m3b_ref,
                       p1wa_ref, p1wb_ref, p1b_ref, p2w_ref, p2b_ref,
                       ow_ref, ob_ref,
                       out_ref):
    dot = functools.partial(jnp.dot, preferred_element_type=jnp.float32)
    relu = lambda v: jnp.maximum(v, 0.0)

    x = x_ref[...]
    s = s_ref[...]

    # ChebConv #1 (K=2): x @ W0 + (S_hat @ x) @ W1 + b   (no inter-layer ReLU in the module)
    h = dot(x, c1w0_ref[...]) + dot(dot(s, x), c1w1_ref[...]) + c1b_ref[...]
    # ChebConv #2 (K=2)
    h = dot(h, c2w0_ref[...]) + dot(dot(s, h), c2w1_ref[...]) + c2b_ref[...]
    # GCN head: relu(Linear)
    h = relu(dot(h, glw_ref[...]) + glb_ref[...])
    # global mean pool as a dense row-normalized operator: (B_pad, N_pad) @ (N_pad, F_pad)
    h1 = dot(pool_ref[...], h)

    # MLP branch: relu(Linear) x 3
    h2 = mol_ref[...]
    h2 = relu(dot(h2, m1w_ref[...]) + m1b_ref[...])
    h2 = relu(dot(h2, m2w_ref[...]) + m2b_ref[...])
    h2 = relu(dot(h2, m3w_ref[...]) + m3b_ref[...])

    # predictor: concat(h1, h2) folded into split first-layer weights
    hp = relu(dot(h1, p1wa_ref[...]) + dot(h2, p1wb_ref[...]) + p1b_ref[...])
    hp = relu(dot(hp, p2w_ref[...]) + p2b_ref[...])

    # output Linear -> lane-dense (B_pad, 128) store; the real scalar lives in column 0
    out_ref[...] = dot(hp, ow_ref[...]) + ob_ref[...]


# ---------------------------------------------------------------------------
# One-time parameter padding (host-side; NOT part of the jitted forward).
# ---------------------------------------------------------------------------
def pack_params(params):
    c1, c2, gl = params["cheb1"], params["cheb2"], params["gcn_lin"]
    m1, m2, m3 = params["mlp"]
    p1, p2, po = params["pred1"], params["pred2"], params["out"]

    f_in, hid = c1["w0"].shape
    gcn_out = gl["w"].shape[1]
    mlp_in, mlp_hid = m1["w"].shape
    mlp_out = m3["w"].shape[1]
    pred_hid = p1["w"].shape[1]

    f_in_p = _round_up(f_in, LANE)
    hid_p = _round_up(hid, LANE)
    gcn_out_p = _round_up(gcn_out, LANE)
    mlp_in_p = _round_up(mlp_in, LANE)
    mlp_hid_p = _round_up(mlp_hid, LANE)
    mlp_out_p = _round_up(mlp_out, LANE)
    pred_hid_p = _round_up(pred_hid, LANE)

    padded = (
        # ChebConv 1
        _pad2(c1["w0"], f_in_p, hid_p), _pad2(c1["w1"], f_in_p, hid_p), _pad2(c1["b"], 1, hid_p),
        # ChebConv 2
        _pad2(c2["w0"], hid_p, hid_p), _pad2(c2["w1"], hid_p, hid_p), _pad2(c2["b"], 1, hid_p),
        # GCN final Linear
        _pad2(gl["w"], hid_p, gcn_out_p), _pad2(gl["b"], 1, gcn_out_p),
        # MLP branch
        _pad2(m1["w"], mlp_in_p, mlp_hid_p), _pad2(m1["b"], 1, mlp_hid_p),
        _pad2(m2["w"], mlp_hid_p, mlp_hid_p), _pad2(m2["b"], 1, mlp_hid_p),
        _pad2(m3["w"], mlp_hid_p, mlp_out_p), _pad2(m3["b"], 1, mlp_out_p),
        # predictor layer 1, split into h1-rows / h2-rows (replaces the concat)
        _pad2(p1["w"][:gcn_out], gcn_out_p, pred_hid_p),
        _pad2(p1["w"][gcn_out:], mlp_out_p, pred_hid_p),
        _pad2(p1["b"], 1, pred_hid_p),
        # predictor layer 2
        _pad2(p2["w"], pred_hid_p, pred_hid_p), _pad2(p2["b"], 1, pred_hid_p),
        # output Linear (padded to one full 128-lane tile; real weights in column 0)
        _pad2(po["w"], pred_hid_p, LANE), _pad2(po["b"], 1, LANE),
    )
    dims = {"f_in_p": f_in_p, "mlp_in_p": mlp_in_p}
    return padded, dims


# ---------------------------------------------------------------------------
# Wrapper: pad per-batch inputs to (8, 128) friendly shapes, call fused kernel, un-pad.
# ---------------------------------------------------------------------------
def model_forward(dims, padded_params, x, shift, pool, mol_features):
    n = x.shape[0]
    b = pool.shape[0]
    n_p = _round_up(n, SUB)
    b_p = _round_up(b, SUB)

    args = [
        _pad2(x, n_p, dims["f_in_p"]),
        _pad2(shift, n_p, n_p),
        _pad2(pool, b_p, n_p),
        _pad2(mol_features, b_p, dims["mlp_in_p"]),
        *padded_params,
    ]

    out_padded = pl.pallas_call(
        _cheb_model_kernel,
        out_shape=jax.ShapeDtypeStruct((b_p, LANE), jnp.float32),
        in_specs=[_vmem()] * len(args),
        out_specs=_vmem(),
        compiler_params=pltpu.CompilerParams(vmem_limit_bytes=32 * 1024 * 1024),
    )(*args)
    return out_padded[:b, :1]


# ---------------------------------------------------------------------------
# Deterministic parameter init (PyTorch-Linear-style uniform bounds; synthetic)
# ---------------------------------------------------------------------------
def _uniform(key, shape, fan_in):
    bound = 1.0 / jnp.sqrt(jnp.float32(fan_in))
    return jax.random.uniform(key, shape, jnp.float32, -bound, bound)


def init_params(key, n_gcn_in, n_gcn_hid, n_gcn_out,
                n_mlp_in, n_mlp_hid, n_mlp_out, n_pred_hid):
    keys = iter(jax.random.split(key, 64))

    def linear(fi, fo):
        return {"w": _uniform(next(keys), (fi, fo), fi),
                "b": _uniform(next(keys), (fo,), fi)}

    def cheb(fi, fo):
        # ChebConv(K=2): two bias-free Linears (one per Chebyshev order) + a shared bias.
        return {"w0": _uniform(next(keys), (fi, fo), fi),
                "w1": _uniform(next(keys), (fi, fo), fi),
                "b": _uniform(next(keys), (fo,), fi)}

    return {
        "cheb1": cheb(n_gcn_in, n_gcn_hid),
        "cheb2": cheb(n_gcn_hid, n_gcn_hid),
        "gcn_lin": linear(n_gcn_hid, n_gcn_out),
        "mlp": [linear(n_mlp_in, n_mlp_hid),
                linear(n_mlp_hid, n_mlp_hid),
                linear(n_mlp_hid, n_mlp_out)],
        "pred1": linear(n_gcn_out + n_mlp_out, n_pred_hid),
        "pred2": linear(n_pred_hid, n_pred_hid),
        "out": linear(n_pred_hid, 1),
    }


if __name__ == "__main__":
    # Hyperparameters consistent with the module constructor (all *_layers = 2)
    n_gcn_inputs, n_gcn_hiddens, n_gcn_layers, n_gcn_outputs = 16, 32, 2, 32
    n_mlp_inputs, n_mlp_hiddens, n_mlp_layers, n_mlp_outputs = 16, 32, 2, 16
    n_predictor_hiddens, n_predictor_layers = 32, 2

    # Small synthetic batch: 3 graphs x 4 nodes, fully connected (no self loops)
    num_graphs, nodes_per_graph = 3, 4
    N = num_graphs * nodes_per_graph
    src, dst, batch_index = [], [], []
    for g in range(num_graphs):
        base = g * nodes_per_graph
        batch_index += [g] * nodes_per_graph
        for i in range(nodes_per_graph):
            for j in range(nodes_per_graph):
                if i != j:
                    src.append(base + i)
                    dst.append(base + j)
    src = jnp.array(src, jnp.int32)
    dst = jnp.array(dst, jnp.int32)
    batch_index = jnp.array(batch_index, jnp.int32)

    key = jax.random.PRNGKey(0)
    k_x, k_m, k_p = jax.random.split(key, 3)
    x = jax.random.normal(k_x, (N, n_gcn_inputs), jnp.float32)
    mol_features = jax.random.normal(k_m, (num_graphs, n_mlp_inputs), jnp.float32)

    # ChebConv shift operator (PyG defaults: 'sym' normalization, lambda_max = 2.0):
    #   S_hat = 2 * L / lambda_max - I = -D^{-1/2} A D^{-1/2}
    # TODO(synk): dense S_hat is graph-preprocessing glue; for very large N this would be
    #             replaced by an index-based (scalar-prefetch) sparse propagation kernel.
    adj = jnp.zeros((N, N), jnp.float32).at[dst, src].set(1.0)
    deg = jnp.sum(adj, axis=1)
    d_inv_sqrt = jnp.where(deg > 0, 1.0 / jnp.sqrt(deg), 0.0)
    shift = -(d_inv_sqrt[:, None] * adj * d_inv_sqrt[None, :])

    # global_mean_pool as a row-normalized (B, N) one-hot operator
    pool = jax.nn.one_hot(batch_index, num_graphs, dtype=jnp.float32).T
    pool = pool / jnp.sum(pool, axis=1, keepdims=True)

    params = init_params(k_p, n_gcn_inputs, n_gcn_hiddens, n_gcn_outputs,
                         n_mlp_inputs, n_mlp_hiddens, n_mlp_outputs,
                         n_predictor_hiddens)
    padded_params, dims = pack_params(params)   # pad weights once, outside jit

    fwd = jax.jit(functools.partial(model_forward, dims))
    out = fwd(padded_params, x, shift, pool, mol_features)
    out = jax.block_until_ready(out)
    assert out.shape == (num_graphs, 1)
    assert bool(jnp.all(jnp.isfinite(out)))
    print("KERNEL_OK")
</pallas_src>

<mosaic_0001>
module attributes {stable_mosaic.version = 11 : i64} {
  func.func @_cheb_model_kernel(%arg0: memref<16x128xf32, #tpu.memory_space<vmem>>, %arg1: memref<16x16xf32, #tpu.memory_space<vmem>>, %arg2: memref<8x16xf32, #tpu.memory_space<vmem>>, %arg3: memref<8x128xf32, #tpu.memory_space<vmem>>, %arg4: memref<128x128xf32, #tpu.memory_space<vmem>>, %arg5: memref<128x128xf32, #tpu.memory_space<vmem>>, %arg6: memref<1x128xf32, #tpu.memory_space<vmem>>, %arg7: memref<128x128xf32, #tpu.memory_space<vmem>>, %arg8: memref<128x128xf32, #tpu.memory_space<vmem>>, %arg9: memref<1x128xf32, #tpu.memory_space<vmem>>, %arg10: memref<128x128xf32, #tpu.memory_space<vmem>>, %arg11: memref<1x128xf32, #tpu.memory_space<vmem>>, %arg12: memref<128x128xf32, #tpu.memory_space<vmem>>, %arg13: memref<1x128xf32, #tpu.memory_space<vmem>>, %arg14: memref<128x128xf32, #tpu.memory_space<vmem>>, %arg15: memref<1x128xf32, #tpu.memory_space<vmem>>, %arg16: memref<128x128xf32, #tpu.memory_space<vmem>>, %arg17: memref<1x128xf32, #tpu.memory_space<vmem>>, %arg18: memref<128x128xf32, #tpu.memory_space<vmem>>, %arg19: memref<128x128xf32, #tpu.memory_space<vmem>>, %arg20: memref<1x128xf32, #tpu.memory_space<vmem>>, %arg21: memref<128x128xf32, #tpu.memory_space<vmem>>, %arg22: memref<1x128xf32, #tpu.memory_space<vmem>>, %arg23: memref<128x128xf32, #tpu.memory_space<vmem>>, %arg24: memref<1x128xf32, #tpu.memory_space<vmem>>, %arg25: memref<8x128xf32, #tpu.memory_space<vmem>>) attributes {dimension_semantics = [], scalar_prefetch = 0 : i64, scratch_operands = 0 : i64, tpu.core_type = #tpu.core_type<tc>} {
    %c0 = arith.constant 0 : index
    %c0_0 = arith.constant 0 : index
    %0 = vector.load %arg0[%c0, %c0_0] : memref<16x128xf32, #tpu.memory_space<vmem>>, vector<16x128xf32>
    %c0_1 = arith.constant 0 : index
    %c0_2 = arith.constant 0 : index
    %1 = vector.load %arg1[%c0_1, %c0_2] : memref<16x16xf32, #tpu.memory_space<vmem>>, vector<16x16xf32>
    %c0_3 = arith.constant 0 : index
    %c0_4 = arith.constant 0 : index
    %2 = vector.load %arg4[%c0_3, %c0_4] : memref<128x128xf32, #tpu.memory_space<vmem>>, vector<128x128xf32>
    %cst = arith.constant dense<0.000000e+00> : vector<16x128xf32>
    %3 = tpu.matmul %0, %2, %cst {dimension_numbers = #tpu.dot_dimension_numbers<[1], [0], [0], [1], [0, 0, 1, 1], [], []>} : vector<16x128xf32>, vector<128x128xf32>, vector<16x128xf32> -> vector<16x128xf32>
    %cst_5 = arith.constant dense<0.000000e+00> : vector<16x128xf32>
    %4 = tpu.matmul %1, %0, %cst_5 {dimension_numbers = #tpu.dot_dimension_numbers<[1], [0], [0], [1], [0, 0, 1, 1], [], []>} : vector<16x16xf32>, vector<16x128xf32>, vector<16x128xf32> -> vector<16x128xf32>
    %c0_6 = arith.constant 0 : index
    %c0_7 = arith.constant 0 : index
    %5 = vector.load %arg5[%c0_6, %c0_7] : memref<128x128xf32, #tpu.memory_space<vmem>>, vector<128x128xf32>
    %cst_8 = arith.constant dense<0.000000e+00> : vector<16x128xf32>
    %6 = tpu.matmul %4, %5, %cst_8 {dimension_numbers = #tpu.dot_dimension_numbers<[1], [0], [0], [1], [0, 0, 1, 1], [], []>} : vector<16x128xf32>, vector<128x128xf32>, vector<16x128xf32> -> vector<16x128xf32>
    %7 = arith.addf %3, %6 : vector<16x128xf32>
    %c0_9 = arith.constant 0 : index
    %c0_10 = arith.constant 0 : index
    %8 = vector.load %arg6[%c0_9, %c0_10] : memref<1x128xf32, #tpu.memory_space<vmem>>, vector<1x128xf32>
    %9 = vector.broadcast %8 : vector<1x128xf32> to vector<16x128xf32>
    %10 = arith.addf %7, %9 : vector<16x128xf32>
    %c0_11 = arith.constant 0 : index
    %c0_12 = arith.constant 0 : index
    %11 = vector.load %arg7[%c0_11, %c0_12] : memref<128x128xf32, #tpu.memory_space<vmem>>, vector<128x128xf32>
    %cst_13 = arith.constant dense<0.000000e+00> : vector<16x128xf32>
    %12 = tpu.matmul %10, %11, %cst_13 {dimension_numbers = #tpu.dot_dimension_numbers<[1], [0], [0], [1], [0, 0, 1, 1], [], []>} : vector<16x128xf32>, vector<128x128xf32>, vector<16x128xf32> -> vector<16x128xf32>
    %cst_14 = arith.constant dense<0.000000e+00> : vector<16x128xf32>
    %13 = tpu.matmul %1, %10, %cst_14 {dimension_numbers = #tpu.dot_dimension_numbers<[1], [0], [0], [1], [0, 0, 1, 1], [], []>} : vector<16x16xf32>, vector<16x128xf32>, vector<16x128xf32> -> vector<16x128xf32>
    %c0_15 = arith.constant 0 : index
    %c0_16 = arith.constant 0 : index
    %14 = vector.load %arg8[%c0_15, %c0_16] : memref<128x128xf32, #tpu.memory_space<vmem>>, vector<128x128xf32>
    %cst_17 = arith.constant dense<0.000000e+00> : vector<16x128xf32>
    %15 = tpu.matmul %13, %14, %cst_17 {dimension_numbers = #tpu.dot_dimension_numbers<[1], [0], [0], [1], [0, 0, 1, 1], [], []>} : vector<16x128xf32>, vector<128x128xf32>, vector<16x128xf32> -> vector<16x128xf32>
    %16 = arith.addf %12, %15 : vector<16x128xf32>
    %c0_18 = arith.constant 0 : index
    %c0_19 = arith.constant 0 : index
    %17 = vector.load %arg9[%c0_18, %c0_19] : memref<1x128xf32, #tpu.memory_space<vmem>>, vector<1x128xf32>
    %18 = vector.broadcast %17 : vector<1x128xf32> to vector<16x128xf32>
    %19 = arith.addf %16, %18 : vector<16x128xf32>
    %c0_20 = arith.constant 0 : index
    %c0_21 = arith.constant 0 : index
    %20 = vector.load %arg10[%c0_20, %c0_21] : memref<128x128xf32, #tpu.memory_space<vmem>>, vector<128x128xf32>
    %cst_22 = arith.constant dense<0.000000e+00> : vector<16x128xf32>
    %21 = tpu.matmul %19, %20, %cst_22 {dimension_numbers = #tpu.dot_dimension_numbers<[1], [0], [0], [1], [0, 0, 1, 1], [], []>} : vector<16x128xf32>, vector<128x128xf32>, vector<16x128xf32> -> vector<16x128xf32>
    %c0_23 = arith.constant 0 : index
    %c0_24 = arith.constant 0 : index
    %22 = vector.load %arg11[%c0_23, %c0_24] : memref<1x128xf32, #tpu.memory_space<vmem>>, vector<1x128xf32>
    %23 = vector.broadcast %22 : vector<1x128xf32> to vector<16x128xf32>
    %24 = arith.addf %21, %23 : vector<16x128xf32>
    %cst_25 = arith.constant 0.000000e+00 : f32
    %25 = vector.broadcast %cst_25 : f32 to vector<16x128xf32>
    %26 = arith.maximumf %24, %25 : vector<16x128xf32>
    %c0_26 = arith.constant 0 : index
    %c0_27 = arith.constant 0 : index
    %27 = vector.load %arg2[%c0_26, %c0_27] : memref<8x16xf32, #tpu.memory_space<vmem>>, vector<8x16xf32>
    %cst_28 = arith.constant dense<0.000000e+00> : vector<8x128xf32>
    %28 = tpu.matmul %27, %26, %cst_28 {dimension_numbers = #tpu.dot_dimension_numbers<[1], [0], [0], [1], [0, 0, 1, 1], [], []>} : vector<8x16xf32>, vector<16x128xf32>, vector<8x128xf32> -> vector<8x128xf32>
    %c0_29 = arith.constant 0 : index
    %c0_30 = arith.constant 0 : index
    %29 = vector.load %arg3[%c0_29, %c0_30] : memref<8x128xf32, #tpu.memory_space<vmem>>, vector<8x128xf32>
    %c0_31 = arith.constant 0 : index
    %c0_32 = arith.constant 0 : index
    %30 = vector.load %arg12[%c0_31, %c0_32] : memref<128x128xf32, #tpu.memory_space<vmem>>, vector<128x128xf32>
    %cst_33 = arith.constant dense<0.000000e+00> : vector<8x128xf32>
    %31 = tpu.matmul %29, %30, %cst_33 {dimension_numbers = #tpu.dot_dimension_numbers<[1], [0], [0], [1], [0, 0, 1, 1], [], []>} : vector<8x128xf32>, vector<128x128xf32>, vector<8x128xf32> -> vector<8x128xf32>
    %c0_34 = arith.constant 0 : index
    %c0_35 = arith.constant 0 : index
    %32 = vector.load %arg13[%c0_34, %c0_35] : memref<1x128xf32, #tpu.memory_space<vmem>>, vector<1x128xf32>
    %33 = vector.broadcast %32 : vector<1x128xf32> to vector<8x128xf32>
    %34 = arith.addf %31, %33 : vector<8x128xf32>
    %cst_36 = arith.constant 0.000000e+00 : f32
    %35 = vector.broadcast %cst_36 : f32 to vector<8x128xf32>
    %36 = arith.maximumf %34, %35 : vector<8x128xf32>
    %c0_37 = arith.constant 0 : index
    %c0_38 = arith.constant 0 : index
    %37 = vector.load %arg14[%c0_37, %c0_38] : memref<128x128xf32, #tpu.memory_space<vmem>>, vector<128x128xf32>
    %cst_39 = arith.constant dense<0.000000e+00> : vector<8x128xf32>
    %38 = tpu.matmul %36, %37, %cst_39 {dimension_numbers = #tpu.dot_dimension_numbers<[1], [0], [0], [1], [0, 0, 1, 1], [], []>} : vector<8x128xf32>, vector<128x128xf32>, vector<8x128xf32> -> vector<8x128xf32>
    %c0_40 = arith.constant 0 : index
    %c0_41 = arith.constant 0 : index
    %39 = vector.load %arg15[%c0_40, %c0_41] : memref<1x128xf32, #tpu.memory_space<vmem>>, vector<1x128xf32>
    %40 = vector.broadcast %39 : vector<1x128xf32> to vector<8x128xf32>
    %41 = arith.addf %38, %40 : vector<8x128xf32>
    %cst_42 = arith.constant 0.000000e+00 : f32
    %42 = vector.broadcast %cst_42 : f32 to vector<8x128xf32>
    %43 = arith.maximumf %41, %42 : vector<8x128xf32>
    %c0_43 = arith.constant 0 : index
    %c0_44 = arith.constant 0 : index
    %44 = vector.load %arg16[%c0_43, %c0_44] : memref<128x128xf32, #tpu.memory_space<vmem>>, vector<128x128xf32>
    %cst_45 = arith.constant dense<0.000000e+00> : vector<8x128xf32>
    %45 = tpu.matmul %43, %44, %cst_45 {dimension_numbers = #tpu.dot_dimension_numbers<[1], [0], [0], [1], [0, 0, 1, 1], [], []>} : vector<8x128xf32>, vector<128x128xf32>, vector<8x128xf32> -> vector<8x128xf32>
    %c0_46 = arith.constant 0 : index
    %c0_47 = arith.constant 0 : index
    %46 = vector.load %arg17[%c0_46, %c0_47] : memref<1x128xf32, #tpu.memory_space<vmem>>, vector<1x128xf32>
    %47 = vector.broadcast %46 : vector<1x128xf32> to vector<8x128xf32>
    %48 = arith.addf %45, %47 : vector<8x128xf32>
    %cst_48 = arith.constant 0.000000e+00 : f32
    %49 = vector.broadcast %cst_48 : f32 to vector<8x128xf32>
    %50 = arith.maximumf %48, %49 : vector<8x128xf32>
    %c0_49 = arith.constant 0 : index
    %c0_50 = arith.constant 0 : index
    %51 = vector.load %arg18[%c0_49, %c0_50] : memref<128x128xf32, #tpu.memory_space<vmem>>, vector<128x128xf32>
    %cst_51 = arith.constant dense<0.000000e+00> : vector<8x128xf32>
    %52 = tpu.matmul %28, %51, %cst_51 {dimension_numbers = #tpu.dot_dimension_numbers<[1], [0], [0], [1], [0, 0, 1, 1], [], []>} : vector<8x128xf32>, vector<128x128xf32>, vector<8x128xf32> -> vector<8x128xf32>
    %c0_52 = arith.constant 0 : index
    %c0_53 = arith.constant 0 : index
    %53 = vector.load %arg19[%c0_52, %c0_53] : memref<128x128xf32, #tpu.memory_space<vmem>>, vector<128x128xf32>
    %cst_54 = arith.constant dense<0.000000e+00> : vector<8x128xf32>
    %54 = tpu.matmul %50, %53, %cst_54 {dimension_numbers = #tpu.dot_dimension_numbers<[1], [0], [0], [1], [0, 0, 1, 1], [], []>} : vector<8x128xf32>, vector<128x128xf32>, vector<8x128xf32> -> vector<8x128xf32>
    %55 = arith.addf %52, %54 : vector<8x128xf32>
    %c0_55 = arith.constant 0 : index
    %c0_56 = arith.constant 0 : index
    %56 = vector.load %arg20[%c0_55, %c0_56] : memref<1x128xf32, #tpu.memory_space<vmem>>, vector<1x128xf32>
    %57 = vector.broadcast %56 : vector<1x128xf32> to vector<8x128xf32>
    %58 = arith.addf %55, %57 : vector<8x128xf32>
    %cst_57 = arith.constant 0.000000e+00 : f32
    %59 = vector.broadcast %cst_57 : f32 to vector<8x128xf32>
    %60 = arith.maximumf %58, %59 : vector<8x128xf32>
    %c0_58 = arith.constant 0 : index
    %c0_59 = arith.constant 0 : index
    %61 = vector.load %arg21[%c0_58, %c0_59] : memref<128x128xf32, #tpu.memory_space<vmem>>, vector<128x128xf32>
    %cst_60 = arith.constant dense<0.000000e+00> : vector<8x128xf32>
    %62 = tpu.matmul %60, %61, %cst_60 {dimension_numbers = #tpu.dot_dimension_numbers<[1], [0], [0], [1], [0, 0, 1, 1], [], []>} : vector<8x128xf32>, vector<128x128xf32>, vector<8x128xf32> -> vector<8x128xf32>
    %c0_61 = arith.constant 0 : index
    %c0_62 = arith.constant 0 : index
    %63 = vector.load %arg22[%c0_61, %c0_62] : memref<1x128xf32, #tpu.memory_space<vmem>>, vector<1x128xf32>
    %64 = vector.broadcast %63 : vector<1x128xf32> to vector<8x128xf32>
    %65 = arith.addf %62, %64 : vector<8x128xf32>
    %cst_63 = arith.constant 0.000000e+00 : f32
    %66 = vector.broadcast %cst_63 : f32 to vector<8x128xf32>
    %67 = arith.maximumf %65, %66 : vector<8x128xf32>
    %c0_64 = arith.constant 0 : index
    %c0_65 = arith.constant 0 : index
    %68 = vector.load %arg23[%c0_64, %c0_65] : memref<128x128xf32, #tpu.memory_space<vmem>>, vector<128x128xf32>
    %cst_66 = arith.constant dense<0.000000e+00> : vector<8x128xf32>
    %69 = tpu.matmul %67, %68, %cst_66 {dimension_numbers = #tpu.dot_dimension_numbers<[1], [0], [0], [1], [0, 0, 1, 1], [], []>} : vector<8x128xf32>, vector<128x128xf32>, vector<8x128xf32> -> vector<8x128xf32>
    %c0_67 = arith.constant 0 : index
    %c0_68 = arith.constant 0 : index
    %70 = vector.load %arg24[%c0_67, %c0_68] : memref<1x128xf32, #tpu.memory_space<vmem>>, vector<1x128xf32>
    %71 = vector.broadcast %70 : vector<1x128xf32> to vector<8x128xf32>
    %72 = arith.addf %69, %71 : vector<8x128xf32>
    %c0_69 = arith.constant 0 : index
    %c0_70 = arith.constant 0 : index
    %73 = vector.load %arg25[%c0_69, %c0_70] : memref<8x128xf32, #tpu.memory_space<vmem>>, vector<8x128xf32>
    tpu.vector_store %arg25[%c0_69, %c0_70], %72 {strides = array<i32>} : memref<8x128xf32, #tpu.memory_space<vmem>>, vector<8x128xf32>,
    return
  }
}

</mosaic_0001>

<bundles_post_ra>
// kernel: model_forward.1
= control target key start
LH: loop header
LB: loop body
LE: loop exit
PB: predicated region body
PF: predicated region fallthrough
CT: control target
= control target key end

     0   :  { %s3814_s0 = inlined_call_operand.vmem [shape: f32[16,128], index: 0, kind: input, shape index: {}]   ;;  %s3815_s1 = inlined_call_operand.vmem [shape: f32[16,16], index: 1, kind: input, shape index: {}]   ;;  %s3816_s2 = inlined_call_operand.vmem [shape: f32[8,16], index: 2, kind: input, shape index: {}]   ;;  %s3817_s3 = inlined_call_operand.vmem [shape: f32[8,128], index: 3, kind: input, shape index: {}]   ;;  %s3818_s4 = inlined_call_operand.hbm [shape: f32[128,128], index: 4, kind: input, shape index: {}]   ;;  %s3819_s5 = inlined_call_operand.hbm [shape: f32[128,128], index: 5, kind: input, shape index: {}]   ;;  %s3820_s6 = inlined_call_operand.hbm [shape: f32[1,128], index: 6, kind: input, shape index: {}]   ;;  %s3821_s7 = inlined_call_operand.hbm [shape: f32[128,128], index: 7, kind: input, shape index: {}]   ;;  %s3822_s8 = inlined_call_operand.hbm [shape: f32[128,128], index: 8, kind: input, shape index: {}]   ;;  %s3823_s9 = inlined_call_operand.hbm [shape: f32[1,128], index: 9, kind: input, shape index: {}]   ;;  %s3824_s10 = inlined_call_operand.hbm [shape: f32[128,128], index: 10, kind: input, shape index: {}]   ;;  %s3825_s11 = inlined_call_operand.hbm [shape: f32[1,128], index: 11, kind: input, shape index: {}]   ;;  %s3826_s12 = inlined_call_operand.hbm [shape: f32[128,128], index: 12, kind: input, shape index: {}]   ;;  %s3827_s13 = inlined_call_operand.hbm [shape: f32[1,128], index: 13, kind: input, shape index: {}]   ;;  %s3828_s14 = inlined_call_operand.vmem [shape: f32[128,128], index: 14, kind: input, shape index: {}]   ;;  %s3829_s15 = inlined_call_operand.hbm [shape: f32[1,128], index: 15, kind: input, shape index: {}]   ;;  %s3830_s16 = inlined_call_operand.hbm [shape: f32[128,128], index: 16, kind: input, shape index: {}]   ;;  %s3831_s17 = inlined_call_operand.hbm [shape: f32[1,128], index: 17, kind: input, shape index: {}]   ;;  %s3832_s18 = inlined_call_operand.hbm [shape: f32[128,128], index: 18, kind: input, shape index: {}]   ;;  %s3833_s19 = inlined_call_operand.hbm [shape: f32[128,128], index: 19, kind: input, shape index: {}]   ;;  %s3834_s20 = inlined_call_operand.hbm [shape: f32[1,128], index: 20, kind: input, shape index: {}]   ;;  %s3835_s21 = inlined_call_operand.hbm [shape: f32[128,128], index: 21, kind: input, shape index: {}]   ;;  %s3836_s22 = inlined_call_operand.hbm [shape: f32[1,128], index: 22, kind: input, shape index: {}]   ;;  %s3837_s23 = inlined_call_operand.hbm [shape: f32[128,128], index: 23, kind: input, shape index: {}]   ;;  %s3838_s24 = inlined_call_operand.vmem [shape: f32[1,128], index: 24, kind: input, shape index: {}]   ;;  %s3839_s25 = inlined_call_operand.vmem [shape: f32[8,128], index: 25, kind: output, shape index: {}]  }
   0x1   :  { %3849 = sst [smem:[#allocation41_spill]] %s3814_s0 }
   0x2   :  { %3850 = sst [smem:[#allocation42_spill]] %s3815_s1 }
   0x3   :  { %3851 = sst [smem:[#allocation43_spill]] %s3816_s2 }
   0x4   :  { %3852 = sst [smem:[#allocation44_spill]] %s3817_s3 }
   0x5   :  { %3853 = sst [smem:[#allocation45_spill]] %s3818_s4 }
   0x6   :  { %3854 = sst [smem:[#allocation46_spill]] %s3819_s5 }
   0x7   :  { %3855 = sst [smem:[#allocation47_spill]] %s3820_s6 }
   0x8   :  { %3856 = sst [smem:[#allocation48_spill]] %s3821_s7 }
   0x9   :  { %3857 = sst [smem:[#allocation49_spill]] %s3822_s8 }
   0xa   :  { %3858 = sst [smem:[#allocation50_spill]] %s3823_s9 }
   0xb   :  { %3859 = sst [smem:[#allocation51_spill]] %s3828_s14 }
   0xc   :  { %3860 = sst [smem:[#allocation52_spill]] %s3838_s24 }
   0xd   :  { %3861 = sst [smem:[#allocation53_spill]] %s3839_s25 }
   0xe   :  { %30 = vsyncpa [#allocation3], 0 }
   0xf   :  { %31 = vsyncpa [#allocation5], 0 }
  0x10   :  { %32 = vsyncpa [#allocation8], 0 }
  0x11   :  { %33 = vsyncpa [#allocation11], 0 }
  0x12   :  { %34 = vsyncpa [#allocation14], 0 }
  0x13   :  { %35 = vsyncpa [#allocation17], 0 }
  0x14   :  { %36 = vsyncpa [#allocation20], 0 }
  0x15   :  { %37 = vsyncpa [#allocation23], 0 }
  0x16   :  { %38 = vsyncpa [#allocation26], 0 }
  0x17   :  { %39 = vsyncpa [#allocation29], 0  ;;  %s3184_s29 = smov [#allocation4]   ;;  %s3185_s6 = smov [#allocation7]  }
  0x18   :  { %s65_s2 = sshll.u32 %s3184_s29, 4  ;;  %s87_s30 = sshll.u32 %s3185_s6, 4  ;;  %s66_s2 = int_to_ptr.vmem [resolvable:$true] %s65_s2  ;;  %s3338_s30 = int_to_ptr.vmem [resolvable:$true] %s87_s30 }
  0x19   :  { %s3862_s26 = sld [smem:[#allocation46_spill]] }
  0x1f   :  { %s2746_s1 = scalar_lea.hbm %s3862_s26, 2048 }
  0x20   :  { %p2747_p0 = scmp.ne.s32.totalorder %s3862_s26, %s2746_s1  ;;  %p2750_p1 = scmp.lt.u32.totalorder %s2746_s1, %s3862_s26 }
  0x22   :  { %p2752_p2 = pnand %p2750_p1, %p2747_p0 }
  0x24   :  { %2755 = shalt.err (!%p2752_p2)
}
  0x25   :  { %s2756_s9 = scalar_lea.vmem %s66_s2, 2048  ;;  %p2761_p4 = scmp.lt.s32.totalorder %s66_s2, %s66_s2 }
  0x26   :  { %p2757_p3 = scmp.ne.s32.totalorder %s66_s2, %s2756_s9  ;;  %p2762_p5 = scmp.lt.s32.totalorder %s2756_s9, %s2756_s9 }
  0x28   :  { %p2763_p6 = por %p2762_p5, %p2761_p4 }
  0x2a   :  { %p2764_p7 = pnand %p2763_p6, %p2757_p3 }
  0x2c   :  { %2767 = shalt.err (!%p2764_p7)
}
  0x2d   :  { %s3186_s5 = smov 128   ;;  %s3187_s0 = smov 8  }
  0x2e   :  { %71 = dma.hbm_to_vmem [thread:$0]  %s3862_s26, 2048, %s66_s2, [#allocation5], %s3186_s5, %s3186_s5, %s3187_s0  }
  0x2f   :  { %s3863_s1 = sld [smem:[#allocation48_spill]] }
  0x35   :  { %s2768_s8 = scalar_lea.hbm %s3863_s1, 2048 }
  0x36   :  { %p2769_p8 = scmp.ne.s32.totalorder %s3863_s1, %s2768_s8  ;;  %p2772_p9 = scmp.lt.u32.totalorder %s2768_s8, %s3863_s1 }
  0x38   :  { %p2774_p10 = pnand %p2772_p9, %p2769_p8 }
  0x3a   :  { %2777 = shalt.err (!%p2774_p10)
}
  0x3b   :  { %s2778_s25 = scalar_lea.vmem %s3338_s30, 2048  ;;  %p2783_p12 = scmp.lt.s32.totalorder %s3338_s30, %s3338_s30 }
  0x3c   :  { %p2779_p11 = scmp.ne.s32.totalorder %s3338_s30, %s2778_s25  ;;  %p2784_p13 = scmp.lt.s32.totalorder %s2778_s25, %s2778_s25 }
  0x3e   :  { %p2785_p0 = por %p2784_p13, %p2783_p12 }
  0x40   :  { %p2786_p1 = pnand %p2785_p0, %p2779_p11 }
  0x42   :  { %2789 = shalt.err (!%p2786_p1)
}
  0x43   :  { %93 = dma.hbm_to_vmem [thread:$0]  %s3863_s1, 2048, %s3338_s30, [#allocation8], %s3186_s5, %s3186_s5, %s3187_s0  }
  0x44   :  { %s3188_s29 = smov [#allocation10]   ;;  %s3189_s7 = smov [#allocation13]  }
  0x45   :  { %s112_s6 = sshll.u32 %s3188_s29, 4  ;;  %s134_s3 = sshll.u32 %s3189_s7, 4  ;;  %s113_s6 = int_to_ptr.vmem [resolvable:$true] %s112_s6  ;;  %s135_s3 = int_to_ptr.vmem [resolvable:$true] %s134_s3 }
  0x46   :  { %s3864_s25 = sld [smem:[#allocation50_spill]] }
  0x4c   :  { %s2790_s4 = scalar_lea.hbm %s3864_s25, 16 }
  0x4d   :  { %p2791_p2 = scmp.ne.s32.totalorder %s3864_s25, %s2790_s4  ;;  %p2794_p3 = scmp.lt.u32.totalorder %s2790_s4, %s3864_s25 }
  0x4f   :  { %p2796_p4 = pnand %p2794_p3, %p2791_p2 }
  0x51   :  { %2799 = shalt.err (!%p2796_p4)
}
  0x52   :  { %s2800_s30 = scalar_lea.vmem %s113_s6, 16  ;;  %s2804_s1 = scalar_lea.vmem %s113_s6, 32 }
  0x53   :  { %p2801_p5 = scmp.ne.s32.totalorder %s113_s6, %s2800_s30  ;;  %p2805_p6 = scmp.lt.s32.totalorder %s113_s6, %s113_s6 }
  0x54   :  { %p2806_p7 = scmp.lt.s32.totalorder %s2804_s1, %s2800_s30 }
  0x56   :  { %p2807_p8 = por %p2806_p7, %p2805_p6 }
  0x58   :  { %p2808_p9 = pnand %p2807_p8, %p2801_p5 }
  0x5a   :  { %2811 = shalt.err (!%p2808_p9)
}
  0x5b   :  { %115 = dma.hbm_to_vmem [thread:$0]  %s3864_s25, 16, %s113_s6, [#allocation11]  }
  0x5c   :  { %s2812_s8 = scalar_lea.hbm %s3825_s11, 16 }
  0x5d   :  { %p2813_p10 = scmp.ne.s32.totalorder %s3825_s11, %s2812_s8  ;;  %p2816_p11 = scmp.lt.u32.totalorder %s2812_s8, %s3825_s11 }
  0x5f   :  { %p2818_p12 = pnand %p2816_p11, %p2813_p10 }
  0x61   :  { %2821 = shalt.err (!%p2818_p12)
}
  0x62   :  { %s2822_s28 = scalar_lea.vmem %s135_s3, 16  ;;  %s2826_s9 = scalar_lea.vmem %s135_s3, 32 }
  0x63   :  { %p2823_p13 = scmp.ne.s32.totalorder %s135_s3, %s2822_s28  ;;  %p2827_p0 = scmp.lt.s32.totalorder %s135_s3, %s135_s3 }
  0x64   :  { %p2828_p1 = scmp.lt.s32.totalorder %s2826_s9, %s2822_s28 }
  0x66   :  { %p2829_p2 = por %p2828_p1, %p2827_p0 }
  0x68   :  { %p2830_p3 = pnand %p2829_p2, %p2823_p13 }
  0x6a   :  { %2833 = shalt.err (!%p2830_p3)
}
  0x6b   :  { %137 = dma.hbm_to_vmem [thread:$0]  %s3825_s11, 16, %s135_s3, [#allocation14]  }
  0x6c   :  { %s3190_s30 = smov [#allocation16]   ;;  %s3191_s2 = smov [#allocation19]  }
  0x6d   :  { %s156_s1 = sshll.u32 %s3190_s30, 4  ;;  %s177_s26 = sshll.u32 %s3191_s2, 4  ;;  %s157_s1 = int_to_ptr.vmem [resolvable:$true] %s156_s1  ;;  %s3399_s26 = int_to_ptr.vmem [resolvable:$true] %s177_s26 }
  0x6e   :  { %s2834_s8 = scalar_lea.hbm %s3827_s13, 16 }
  0x6f   :  { %p2835_p4 = scmp.ne.s32.totalorder %s3827_s13, %s2834_s8  ;;  %p2838_p5 = scmp.lt.u32.totalorder %s2834_s8, %s3827_s13 }
  0x71   :  { %p2840_p6 = pnand %p2838_p5, %p2835_p4 }
  0x73   :  { %2843 = shalt.err (!%p2840_p6)
}
  0x74   :  { %s2844_s11 = scalar_lea.vmem %s157_s1, 16  ;;  %s2848_s3 = scalar_lea.vmem %s157_s1, 32 }
  0x75   :  { %p2845_p7 = scmp.ne.s32.totalorder %s157_s1, %s2844_s11  ;;  %p2849_p8 = scmp.lt.s32.totalorder %s157_s1, %s157_s1 }
  0x76   :  { %p2850_p9 = scmp.lt.s32.totalorder %s2848_s3, %s2844_s11 }
  0x78   :  { %p2851_p10 = por %p2850_p9, %p2849_p8 }
  0x7a   :  { %p2852_p11 = pnand %p2851_p10, %p2845_p7 }
  0x7c   :  { %2855 = shalt.err (!%p2852_p11)
}
  0x7d   :  { %159 = dma.hbm_to_vmem [thread:$0]  %s3827_s13, 16, %s157_s1, [#allocation17]  }
  0x7e   :  { %s2856_s30 = scalar_lea.hbm %s3830_s16, 2048 }
  0x7f   :  { %p2857_p12 = scmp.ne.s32.totalorder %s3830_s16, %s2856_s30  ;;  %p2860_p13 = scmp.lt.u32.totalorder %s2856_s30, %s3830_s16 }
  0x81   :  { %p2862_p0 = pnand %p2860_p13, %p2857_p12 }
  0x83   :  { %2865 = shalt.err (!%p2862_p0)
}
  0x84   :  { %s2866_s14 = scalar_lea.vmem %s3399_s26, 2048  ;;  %p2871_p2 = scmp.lt.s32.totalorder %s3399_s26, %s3399_s26 }
  0x85   :  { %p2867_p1 = scmp.ne.s32.totalorder %s3399_s26, %s2866_s14  ;;  %p2872_p3 = scmp.lt.s32.totalorder %s2866_s14, %s2866_s14 }
  0x87   :  { %p2873_p4 = por %p2872_p3, %p2871_p2 }
  0x89   :  { %p2874_p5 = pnand %p2873_p4, %p2867_p1 }
  0x8b   :  { %2877 = shalt.err (!%p2874_p5)
}
  0x8c   :  { %183 = dma.hbm_to_vmem [thread:$0]  %s3830_s16, 2048, %s3399_s26, [#allocation20], %s3186_s5, %s3186_s5, %s3187_s0  }
  0x8d   :  { %s3192_s24 = smov [#allocation22]   ;;  %s3193_s4 = smov [#allocation25]  }
  0x8e   :  { %s199_s27 = sshll.u32 %s3192_s24, 4  ;;  %s224_s11 = sshll.u32 %s3193_s4, 4  ;;  %s200_s27 = int_to_ptr.vmem [resolvable:$true] %s199_s27  ;;  %s225_s11 = int_to_ptr.vmem [resolvable:$true] %s224_s11 }
  0x8f   :  { %s2878_s9 = scalar_lea.hbm %s3832_s18, 2048 }
  0x90   :  { %p2879_p6 = scmp.ne.s32.totalorder %s3832_s18, %s2878_s9  ;;  %p2882_p7 = scmp.lt.u32.totalorder %s2878_s9, %s3832_s18 }
  0x92   :  { %p2884_p8 = pnand %p2882_p7, %p2879_p6 }
  0x94   :  { %2887 = shalt.err (!%p2884_p8)
}
  0x95   :  { %s2888_s16 = scalar_lea.vmem %s200_s27, 2048  ;;  %p2893_p10 = scmp.lt.s32.totalorder %s200_s27, %s200_s27 }
  0x96   :  { %p2889_p9 = scmp.ne.s32.totalorder %s200_s27, %s2888_s16  ;;  %p2894_p11 = scmp.lt.s32.totalorder %s2888_s16, %s2888_s16 }
  0x98   :  { %p2895_p12 = por %p2894_p11, %p2893_p10 }
  0x9a   :  { %p2896_p13 = pnand %p2895_p12, %p2889_p9 }
  0x9c   :  { %2899 = shalt.err (!%p2896_p13)
}
  0x9d   :  { %205 = dma.hbm_to_vmem [thread:$0]  %s3832_s18, 2048, %s200_s27, [#allocation23], %s3186_s5, %s3186_s5, %s3187_s0  }
  0x9e   :  { %s2900_s14 = scalar_lea.hbm %s3834_s20, 16 }
  0x9f   :  { %p2901_p0 = scmp.ne.s32.totalorder %s3834_s20, %s2900_s14  ;;  %p2904_p1 = scmp.lt.u32.totalorder %s2900_s14, %s3834_s20 }
  0xa1   :  { %p2906_p2 = pnand %p2904_p1, %p2901_p0 }
  0xa3   :  { %2909 = shalt.err (!%p2906_p2)
}
  0xa4   :  { %s2910_s3 = scalar_lea.vmem %s225_s11, 16  ;;  %s2914_s28 = scalar_lea.vmem %s225_s11, 32 }
  0xa5   :  { %p2911_p3 = scmp.ne.s32.totalorder %s225_s11, %s2910_s3  ;;  %p2915_p4 = scmp.lt.s32.totalorder %s225_s11, %s225_s11 }
  0xa6   :  { %p2916_p5 = scmp.lt.s32.totalorder %s2914_s28, %s2910_s3 }
  0xa8   :  { %p2917_p6 = por %p2916_p5, %p2915_p4 }
  0xaa   :  { %p2918_p7 = pnand %p2917_p6, %p2911_p3 }
  0xac   :  { %2921 = shalt.err (!%p2918_p7)
}
  0xad   :  { %227 = dma.hbm_to_vmem [thread:$0]  %s3834_s20, 16, %s225_s11, [#allocation26]  }
  0xae   :  { %s3194_s9 = smov [#allocation28]   ;;  %s3195_s25 = smov [#allocation2]  }
  0xaf   :  { %s246_s6 = sshll.u32 %s3194_s9, 4  ;;  %s53_s30 = sshll.u32 %s3195_s25, 4  ;;  %s247_s6 = int_to_ptr.vmem [resolvable:$true] %s246_s6  ;;  %s3460_s30 = int_to_ptr.vmem [resolvable:$true] %s53_s30 }
  0xb0   :  { %s2922_s26 = scalar_lea.hbm %s3836_s22, 16 }
  0xb1   :  { %p2923_p8 = scmp.ne.s32.totalorder %s3836_s22, %s2922_s26  ;;  %p2926_p9 = scmp.lt.u32.totalorder %s2922_s26, %s3836_s22 }
  0xb3   :  { %p2928_p10 = pnand %p2926_p9, %p2923_p8 }
  0xb5   :  { %2931 = shalt.err (!%p2928_p10)
}
  0xb6   :  { %s2932_s20 = scalar_lea.vmem %s247_s6, 16  ;;  %s2936_s11 = scalar_lea.vmem %s247_s6, 32 }
  0xb7   :  { %p2933_p11 = scmp.ne.s32.totalorder %s247_s6, %s2932_s20  ;;  %p2937_p12 = scmp.lt.s32.totalorder %s247_s6, %s247_s6 }
  0xb8   :  { %p2938_p13 = scmp.lt.s32.totalorder %s2936_s11, %s2932_s20 }
  0xba   :  { %p2939_p0 = por %p2938_p13, %p2937_p12 }
  0xbc   :  { %p2940_p1 = pnand %p2939_p0, %p2933_p11 }
  0xbe   :  { %2943 = shalt.err (!%p2940_p1)
}
  0xbf   :  { %249 = dma.hbm_to_vmem [thread:$0]  %s3836_s22, 16, %s247_s6, [#allocation29]  }
  0xc0   :  { %s3865_s3 = sld [smem:[#allocation45_spill]] }
  0xc6   :  { %s2944_s28 = scalar_lea.hbm %s3865_s3, 2048 }
  0xc7   :  { %p2945_p2 = scmp.ne.s32.totalorder %s3865_s3, %s2944_s28  ;;  %p2948_p3 = scmp.lt.u32.totalorder %s2944_s28, %s3865_s3 }
  0xc9   :  { %p2950_p4 = pnand %p2948_p3, %p2945_p2 }
  0xcb   :  { %2953 = shalt.err (!%p2950_p4)
}
  0xcc   :  { %s2954_s2 = scalar_lea.vmem %s3460_s30, 2048  ;;  %p2959_p6 = scmp.lt.s32.totalorder %s3460_s30, %s3460_s30 }
  0xcd   :  { %p2955_p5 = scmp.ne.s32.totalorder %s3460_s30, %s2954_s2  ;;  %p2960_p7 = scmp.lt.s32.totalorder %s2954_s2, %s2954_s2 }
  0xcf   :  { %p2961_p8 = por %p2960_p7, %p2959_p6 }
  0xd1   :  { %p2962_p9 = pnand %p2961_p8, %p2955_p5 }
  0xd3   :  { %2965 = shalt.err (!%p2962_p9)
}
  0xd4   :  { %59 = dma.hbm_to_vmem [thread:$0]  %s3865_s3, 2048, %s3460_s30, [#allocation3], %s3186_s5, %s3186_s5, %s3187_s0  }
  0xd5   :  { %s3196_s16 = smov [#allocation6]   ;;  %s3197_s29 = smov [#allocation9]  }
  0xd6   :  { %s78_s26 = sshll.u32 %s3196_s16, 4  ;;  %s99_s7 = sshll.u32 %s3197_s29, 4  ;;  %s79_s26 = int_to_ptr.vmem [resolvable:$true] %s78_s26  ;;  %s3494_s7 = int_to_ptr.vmem [resolvable:$true] %s99_s7 }
  0xd7   :  { %s3866_s20 = sld [smem:[#allocation47_spill]] }
  0xdd   :  { %s2966_s11 = scalar_lea.hbm %s3866_s20, 16 }
  0xde   :  { %p2967_p10 = scmp.ne.s32.totalorder %s3866_s20, %s2966_s11  ;;  %p2970_p11 = scmp.lt.u32.totalorder %s2966_s11, %s3866_s20 }
  0xe0   :  { %p2972_p12 = pnand %p2970_p11, %p2967_p10 }
  0xe2   :  { %2975 = shalt.err (!%p2972_p12)
}
  0xe3   :  { %s2976_s30 = scalar_lea.vmem %s79_s26, 16  ;;  %s2980_s3 = scalar_lea.vmem %s79_s26, 32 }
  0xe4   :  { %p2977_p13 = scmp.ne.s32.totalorder %s79_s26, %s2976_s30  ;;  %p2981_p0 = scmp.lt.s32.totalorder %s79_s26, %s79_s26 }
  0xe5   :  { %p2982_p1 = scmp.lt.s32.totalorder %s2980_s3, %s2976_s30 }
  0xe7   :  { %p2983_p2 = por %p2982_p1, %p2981_p0 }
  0xe9   :  { %p2984_p3 = pnand %p2983_p2, %p2977_p13 }
  0xeb   :  { %2987 = shalt.err (!%p2984_p3)
}
  0xec   :  { %81 = dma.hbm_to_vmem [thread:$0]  %s3866_s20, 16, %s79_s26, [#allocation5]  }
  0xed   :  { %s3867_s25 = sld [smem:[#allocation49_spill]] }
  0xf3   :  { %s2988_s2 = scalar_lea.hbm %s3867_s25, 2048 }
  0xf4   :  { %p2989_p4 = scmp.ne.s32.totalorder %s3867_s25, %s2988_s2  ;;  %p2992_p5 = scmp.lt.u32.totalorder %s2988_s2, %s3867_s25 }
  0xf6   :  { %p2994_p6 = pnand %p2992_p5, %p2989_p4 }
  0xf8   :  { %2997 = shalt.err (!%p2994_p6)
}
  0xf9   :  { %s2998_s8 = scalar_lea.vmem %s3494_s7, 2048  ;;  %p3003_p8 = scmp.lt.s32.totalorder %s3494_s7, %s3494_s7 }
  0xfa   :  { %p2999_p7 = scmp.ne.s32.totalorder %s3494_s7, %s2998_s8  ;;  %p3004_p9 = scmp.lt.s32.totalorder %s2998_s8, %s2998_s8 }
  0xfc   :  { %p3005_p10 = por %p3004_p9, %p3003_p8 }
  0xfe   :  { %p3006_p11 = pnand %p3005_p10, %p2999_p7 }
 0x100   :  { %3009 = shalt.err (!%p3006_p11)
}
 0x101   :  { %105 = dma.hbm_to_vmem [thread:$0]  %s3867_s25, 2048, %s3494_s7, [#allocation8], %s3186_s5, %s3186_s5, %s3187_s0  }
 0x102   :  { %s3198_s20 = smov [#allocation12]   ;;  %s3199_s13 = smov [#allocation15]  }
 0x103   :  { %s121_s11 = sshll.u32 %s3198_s20, 4  ;;  %s143_s1 = sshll.u32 %s3199_s13, 4  ;;  %s122_s11 = int_to_ptr.vmem [resolvable:$true] %s121_s11  ;;  %s3528_s1 = int_to_ptr.vmem [resolvable:$true] %s143_s1 }
 0x104   :  { %s3010_s30 = scalar_lea.hbm %s3824_s10, 2048 }
 0x105   :  { %p3011_p12 = scmp.ne.s32.totalorder %s3824_s10, %s3010_s30  ;;  %p3014_p13 = scmp.lt.u32.totalorder %s3010_s30, %s3824_s10 }
 0x107   :  { %p3016_p0 = pnand %p3014_p13, %p3011_p12 }
 0x109   :  { %3019 = shalt.err (!%p3016_p0)
}
 0x10a   :  { %s3020_s7 = scalar_lea.vmem %s122_s11, 2048  ;;  %p3025_p2 = scmp.lt.s32.totalorder %s122_s11, %s122_s11 }
 0x10b   :  { %p3021_p1 = scmp.ne.s32.totalorder %s122_s11, %s3020_s7  ;;  %p3026_p3 = scmp.lt.s32.totalorder %s3020_s7, %s3020_s7 }
 0x10d   :  { %p3027_p4 = por %p3026_p3, %p3025_p2 }
 0x10f   :  { %p3028_p5 = pnand %p3027_p4, %p3021_p1 }
 0x111   :  { %3031 = shalt.err (!%p3028_p5)
}
 0x112   :  { %127 = dma.hbm_to_vmem [thread:$0]  %s3824_s10, 2048, %s122_s11, [#allocation11], %s3186_s5, %s3186_s5, %s3187_s0  }
 0x113   :  { %s3032_s6 = scalar_lea.hbm %s3826_s12, 2048 }
 0x114   :  { %p3033_p6 = scmp.ne.s32.totalorder %s3826_s12, %s3032_s6  ;;  %p3036_p7 = scmp.lt.u32.totalorder %s3032_s6, %s3826_s12 }
 0x116   :  { %p3038_p8 = pnand %p3036_p7, %p3033_p6 }
 0x118   :  { %3041 = shalt.err (!%p3038_p8)
}
 0x119   :  { %s3042_s14 = scalar_lea.vmem %s3528_s1, 2048  ;;  %p3047_p10 = scmp.lt.s32.totalorder %s3528_s1, %s3528_s1 }
 0x11a   :  { %p3043_p9 = scmp.ne.s32.totalorder %s3528_s1, %s3042_s14  ;;  %p3048_p11 = scmp.lt.s32.totalorder %s3042_s14, %s3042_s14 }
 0x11c   :  { %p3049_p12 = por %p3048_p11, %p3047_p10 }
 0x11e   :  { %p3050_p13 = pnand %p3049_p12, %p3043_p9 }
 0x120   :  { %3053 = shalt.err (!%p3050_p13)
}
 0x121   :  { %149 = dma.hbm_to_vmem [thread:$0]  %s3826_s12, 2048, %s3528_s1, [#allocation14], %s3186_s5, %s3186_s5, %s3187_s0  }
 0x122   :  { %s3200_s11 = smov [#allocation18]   ;;  %s3201_s24 = smov [#allocation21]  }
 0x123   :  { %s168_s13 = sshll.u32 %s3200_s11, 4  ;;  %s190_s4 = sshll.u32 %s3201_s24, 4  ;;  %s169_s13 = int_to_ptr.vmem [resolvable:$true] %s168_s13  ;;  %s191_s4 = int_to_ptr.vmem [resolvable:$true] %s190_s4 }
 0x124   :  { %s3054_s28 = scalar_lea.hbm %s3829_s15, 16 }
 0x125   :  { %p3055_p0 = scmp.ne.s32.totalorder %s3829_s15, %s3054_s28  ;;  %p3058_p1 = scmp.lt.u32.totalorder %s3054_s28, %s3829_s15 }
 0x127   :  { %p3060_p2 = pnand %p3058_p1, %p3055_p0 }
 0x129   :  { %3063 = shalt.err (!%p3060_p2)
}
 0x12a   :  { %s3064_s12 = scalar_lea.vmem %s169_s13, 16  ;;  %s3068_s1 = scalar_lea.vmem %s169_s13, 32 }
 0x12b   :  { %p3065_p3 = scmp.ne.s32.totalorder %s169_s13, %s3064_s12  ;;  %p3069_p4 = scmp.lt.s32.totalorder %s169_s13, %s169_s13 }
 0x12c   :  { %p3070_p5 = scmp.lt.s32.totalorder %s3068_s1, %s3064_s12 }
 0x12e   :  { %p3071_p6 = por %p3070_p5, %p3069_p4 }
 0x130   :  { %p3072_p7 = pnand %p3071_p6, %p3065_p3 }
 0x132   :  { %3075 = shalt.err (!%p3072_p7)
}
 0x133   :  { %171 = dma.hbm_to_vmem [thread:$0]  %s3829_s15, 16, %s169_s13, [#allocation17]  }
 0x134   :  { %s3076_s16 = scalar_lea.hbm %s3831_s17, 16 }
 0x135   :  { %p3077_p8 = scmp.ne.s32.totalorder %s3831_s17, %s3076_s16  ;;  %p3080_p9 = scmp.lt.u32.totalorder %s3076_s16, %s3831_s17 }
 0x137   :  { %p3082_p10 = pnand %p3080_p9, %p3077_p8 }
 0x139   :  { %3085 = shalt.err (!%p3082_p10)
}
 0x13a   :  { %s3086_s10 = scalar_lea.vmem %s191_s4, 16  ;;  %s3090_s20 = scalar_lea.vmem %s191_s4, 32 }
 0x13b   :  { %p3087_p11 = scmp.ne.s32.totalorder %s191_s4, %s3086_s10  ;;  %p3091_p12 = scmp.lt.s32.totalorder %s191_s4, %s191_s4 }
 0x13c   :  { %p3092_p13 = scmp.lt.s32.totalorder %s3090_s20, %s3086_s10 }
 0x13e   :  { %p3093_p0 = por %p3092_p13, %p3091_p12 }
 0x140   :  { %p3094_p1 = pnand %p3093_p0, %p3087_p11 }
 0x142   :  { %3097 = shalt.err (!%p3094_p1)
}
 0x143   :  { %193 = dma.hbm_to_vmem [thread:$0]  %s3831_s17, 16, %s191_s4, [#allocation20]  }
 0x144   :  { %s3202_s13 = smov [#allocation24]   ;;  %s3203_s30 = smov [#allocation27]  }
 0x145   :  { %s211_s24 = sshll.u32 %s3202_s13, 4  ;;  %s233_s3 = sshll.u32 %s3203_s30, 4  ;;  %s212_s24 = int_to_ptr.vmem [resolvable:$true] %s211_s24  ;;  %s3589_s3 = int_to_ptr.vmem [resolvable:$true] %s233_s3 }
 0x146   :  { %s3098_s27 = scalar_lea.hbm %s3833_s19, 2048 }
 0x147   :  { %p3099_p2 = scmp.ne.s32.totalorder %s3833_s19, %s3098_s27  ;;  %p3102_p3 = scmp.lt.u32.totalorder %s3098_s27, %s3833_s19 }
 0x149   :  { %p3104_p4 = pnand %p3102_p3, %p3099_p2 }
 0x14b   :  { %3107 = shalt.err (!%p3104_p4)
}
 0x14c   :  { %s3108_s17 = scalar_lea.vmem %s212_s24, 2048  ;;  %p3113_p6 = scmp.lt.s32.totalorder %s212_s24, %s212_s24 }
 0x14d   :  { %p3109_p5 = scmp.ne.s32.totalorder %s212_s24, %s3108_s17  ;;  %p3114_p7 = scmp.lt.s32.totalorder %s3108_s17, %s3108_s17 }
 0x14f   :  { %p3115_p8 = por %p3114_p7, %p3113_p6 }
 0x151   :  { %p3116_p9 = pnand %p3115_p8, %p3109_p5 }
 0x153   :  { %3119 = shalt.err (!%p3116_p9)
}
 0x154   :  { %217 = dma.hbm_to_vmem [thread:$0]  %s3833_s19, 2048, %s212_s24, [#allocation23], %s3186_s5, %s3186_s5, %s3187_s0  }
 0x155   :  { %s3120_s6 = scalar_lea.hbm %s3835_s21, 2048 }
 0x156   :  { %p3121_p10 = scmp.ne.s32.totalorder %s3835_s21, %s3120_s6  ;;  %p3124_p11 = scmp.lt.u32.totalorder %s3120_s6, %s3835_s21 }
 0x158   :  { %p3126_p12 = pnand %p3124_p11, %p3121_p10 }
 0x15a   :  { %3129 = shalt.err (!%p3126_p12)
}
 0x15b   :  { %s3130_s14 = scalar_lea.vmem %s3589_s3, 2048  ;;  %p3135_p0 = scmp.lt.s32.totalorder %s3589_s3, %s3589_s3 }
 0x15c   :  { %p3131_p13 = scmp.ne.s32.totalorder %s3589_s3, %s3130_s14  ;;  %p3136_p1 = scmp.lt.s32.totalorder %s3130_s14, %s3130_s14 }
 0x15e   :  { %p3137_p2 = por %p3136_p1, %p3135_p0 }
 0x160   :  { %p3138_p3 = pnand %p3137_p2, %p3131_p13 }
 0x162   :  { %3141 = shalt.err (!%p3138_p3)
}
 0x163   :  { %239 = dma.hbm_to_vmem [thread:$0]  %s3835_s21, 2048, %s3589_s3, [#allocation26], %s3186_s5, %s3186_s5, %s3187_s0  }
 0x164   :  { %s3204_s20 = smov [#allocation30]   ;;  %s3142_s24 = scalar_lea.hbm %s3837_s23, 2048 }
 0x165   :  { %s255_s15 = sshll.u32 %s3204_s20, 4  ;;  %p3143_p4 = scmp.ne.s32.totalorder %s3837_s23, %s3142_s24  ;;  %s256_s15 = int_to_ptr.vmem [resolvable:$true] %s255_s15 }
 0x166   :  { %p3146_p5 = scmp.lt.u32.totalorder %s3142_s24, %s3837_s23 }
 0x168   :  { %p3148_p6 = pnand %p3146_p5, %p3143_p4 }
 0x16a   :  { %3151 = shalt.err (!%p3148_p6)
}
 0x16b   :  { %s3152_s7 = scalar_lea.vmem %s256_s15, 2048  ;;  %p3157_p8 = scmp.lt.s32.totalorder %s256_s15, %s256_s15 }
 0x16c   :  { %p3153_p7 = scmp.ne.s32.totalorder %s256_s15, %s3152_s7  ;;  %p3158_p9 = scmp.lt.s32.totalorder %s3152_s7, %s3152_s7 }
 0x16e   :  { %p3159_p10 = por %p3158_p9, %p3157_p8 }
 0x170   :  { %p3160_p11 = pnand %p3159_p10, %p3153_p7 }
 0x172   :  { %3163 = shalt.err (!%p3160_p11)
}
 0x173   :  { %261 = dma.hbm_to_vmem [thread:$0]  %s3837_s23, 2048, %s256_s15, [#allocation29], %s3186_s5, %s3186_s5, %s3187_s0  }
 0x174   :  { %3164 = dma.done.wait [#allocation3], 2048  }
 0x175   :  { %3165 = vsyncadd [#allocation3], 4294965248 }
 0x176   :  { %3166 = dma.done.wait [#allocation5], 2064  }
 0x177   :  { %3167 = vsyncadd [#allocation5], 4294965232 }
 0x178   :  { %3168 = dma.done.wait [#allocation8], 4096  }
 0x179   :  { %3169 = vsyncadd [#allocation8], 4294963200 }
 0x17a   :  { %3170 = dma.done.wait [#allocation11], 2064  }
 0x17b   :  { %3171 = vsyncadd [#allocation11], 4294965232 }
 0x17c   :  { %3172 = dma.done.wait [#allocation14], 2064  }
 0x17d   :  { %3173 = vsyncadd [#allocation14], 4294965232 }
 0x17e   :  { %3174 = dma.done.wait [#allocation17], 32  }
 0x17f   :  { %3175 = vsyncadd [#allocation17], 4294967264 }
 0x180   :  { %3176 = dma.done.wait [#allocation20], 2064  }
 0x181   :  { %3177 = vsyncadd [#allocation20], 4294965232 }
 0x182   :  { %3178 = dma.done.wait [#allocation23], 4096  }
 0x183   :  { %3179 = vsyncadd [#allocation23], 4294963200 }
 0x184   :  { %3180 = dma.done.wait [#allocation26], 2064  }
 0x185   :  { %3181 = vsyncadd [#allocation26], 4294965232 }
 0x186   :  { %3182 = dma.done.wait [#allocation29], 2064  }
 0x187   :  { %3183 = vsyncadd [#allocation29], 4294965232  ;;  %vm341_vm0 = vcmask 130048   ;;  %s3868_s0 = sld [smem:[#allocation41_spill]]  ;;  %s3869_s4 = sld [smem:[#allocation42_spill]]  ;;  %v423_v4 = vld [vmem:[#allocation4] sm:$0xff] }
 0x188   :  { %v424_v5 = vld [vmem:[#allocation4 + $0x8] sm:$0xff]  ;;  %v425_v7 = vld [vmem:[#allocation4 + $0x10] sm:$0xff]  ;;  %v426_v8 = vld [vmem:[#allocation4 + $0x18] sm:$0xff]  ;;  %vm3206_vm1 = vmmov 0   ;;  %s3870_s16 = sld [smem:[#allocation43_spill]]  ;;  %s3871_s26 = sld [smem:[#allocation44_spill]] }
 0x189   :  { %v2383_v6 = vpack.c.bf16 %v424_v5, %v423_v4  ;;  %v2387_v10 = vpack.c.bf16 %v426_v8, %v425_v7  ;;  %v427_v11 = vld [vmem:[#allocation4 + $0x20] sm:$0xff]  ;;  %v428_v12 = vld [vmem:[#allocation4 + $0x28] sm:$0xff]  ;;  %v429_v14 = vld [vmem:[#allocation4 + $0x30] sm:$0xff]  ;;  %s3872_s10 = sld [smem:[#allocation51_spill]]  ;;  %s3873_s15 = sld [smem:[#allocation52_spill]] }
 0x18a   :  { %v2391_v13 = vpack.c.bf16 %v428_v12, %v427_v11  ;;  %v430_v15 = vld [vmem:[#allocation4 + $0x38] sm:$0xff]  ;;  %v431_v17 = vld [vmem:[#allocation4 + $0x40] sm:$0xff]  ;;  %v432_v18 = vld [vmem:[#allocation4 + $0x48] sm:$0xff]  ;;  %s3874_s24 = sld [smem:[#allocation53_spill]] }
 0x18b   :  { %v2395_v16 = vpack.c.bf16 %v430_v15, %v429_v14  ;;  %v2399_v19 = vpack.c.bf16 %v432_v18, %v431_v17  ;;  %v433_v20 = vld [vmem:[#allocation4 + $0x50] sm:$0xff]  ;;  %v434_v21 = vld [vmem:[#allocation4 + $0x58] sm:$0xff]  ;;  %v435_v23 = vld [vmem:[#allocation4 + $0x60] sm:$0xff] }
 0x18c   :  { %v2403_v22 = vpack.c.bf16 %v434_v21, %v433_v20  ;;  %v436_v24 = vld [vmem:[#allocation4 + $0x68] sm:$0xff]  ;;  %v437_v26 = vld [vmem:[#allocation4 + $0x70] sm:$0xff]  ;;  %v438_v27 = vld [vmem:[#allocation4 + $0x78] sm:$0xff] }
 0x18d   :  { %v3644_v0 = vld [vmem:[%s3868_s0] sm:$0xff]  ;;  %v3649_v1 = vld [vmem:[%s3868_s0 + $0x8] sm:$0xff]  ;;  %v2407_v25 = vpack.c.bf16 %v436_v24, %v435_v23  ;;  %v2411_v28 = vpack.c.bf16 %v438_v27, %v437_v26  ;;  %v327_v32 = vld [vmem:[#allocation2 + $0x10] sm:$0xff] }
 0x18e   :  { %v323_v2 = vld [vmem:[%s3869_s4] sm:$0xff]  ;;  %v2379_v3 = vpack.c.bf16 %v3649_v1, %v3644_v0  ;;  %v3661_v9 = vld [vmem:[%s3869_s4 + $0x8] sm:$0xff]  ;;  %v328_v33 = vld [vmem:[#allocation2 + $0x18] sm:$0xff] }
 0x18f   :  { %1942 = vmatprep.mubr.msk.f32.mxu1 %vm341_vm0, %v323_v2  ;;  %2019 = vmatprep.mubr.msk.f32.mxu0 %vm341_vm0, %v323_v2  ;;  %v325_v29 = vld [vmem:[#allocation2] sm:$0xff]  ;;  %v326_v30 = vld [vmem:[#allocation2 + $0x8] sm:$0xff]  ;;  %v2419_v36 = vpack.c.bf16 %v328_v33, %v327_v32  ;;  %v331_v40 = vld [vmem:[#allocation2 + $0x30] sm:$0xff] }
 0x190   :  { %2380 = vmatprep.subr.bf16.mxu1 %v2379_v3  ;;  %v2415_v31 = vpack.c.bf16 %v326_v30, %v325_v29  ;;  %v329_v37 = vld [vmem:[#allocation2 + $0x20] sm:$0xff]  ;;  %v330_v38 = vld [vmem:[#allocation2 + $0x28] sm:$0xff]  ;;  %v332_v41 = vld [vmem:[#allocation2 + $0x38] sm:$0xff] }
 0x191   :  { %2382 = vmatpush3.bf16.msra.mxu1 %v2379_v3  ;;  %v2423_v39 = vpack.c.bf16 %v330_v38, %v329_v37  ;;  %v2427_v42 = vpack.c.bf16 %v332_v41, %v331_v40  ;;  %v333_v43 = vld [vmem:[#allocation2 + $0x40] sm:$0xff]  ;;  %v334_v44 = vld [vmem:[#allocation2 + $0x48] sm:$0xff]  ;;  %v335_v46 = vld [vmem:[#allocation2 + $0x50] sm:$0xff] }
 0x192   :  { %2384 = vmatprep.subr.bf16.mxu1 %v2383_v6  ;;  %v2431_v45 = vpack.c.bf16 %v334_v44, %v333_v43  ;;  %v336_v47 = vld [vmem:[#allocation2 + $0x58] sm:$0xff]  ;;  %v337_v49 = vld [vmem:[#allocation2 + $0x60] sm:$0xff]  ;;  %v338_v50 = vld [vmem:[#allocation2 + $0x68] sm:$0xff] }
 0x193   :  { %v2435_v48 = vpack.c.bf16 %v336_v47, %v335_v46  ;;  %v2439_v51 = vpack.c.bf16 %v338_v50, %v337_v49  ;;  %v339_v52 = vld [vmem:[#allocation2 + $0x70] sm:$0xff]  ;;  %v340_v53 = vld [vmem:[#allocation2 + $0x78] sm:$0xff]  ;;  %v1706_v55 = vld [vmem:[#allocation6] ss:$0 sm:$0xff] }
 0x194   :  { %1943 = vmatmul.mubr.msk.f32.vlgmr.msra.gmra.mrb[0].mxu1 %vm341_vm0, %v3661_v9  ;;  %v2443_v54 = vpack.c.bf16 %v340_v53, %v339_v52  ;;  %v689_v59 = vld [vmem:[#allocation9] sm:$0xff]  ;;  %v690_v60 = vld [vmem:[#allocation9 + $0x8] sm:$0xff]  ;;  %v692_v2 = vld [vmem:[#allocation9 + $0x18] sm:$0xff] }
 0x195   :  { %2386 = vmatpush3.bf16.msra.mxu1 %v2383_v6  ;;  %v2451_v63 = vpack.c.bf16 %v690_v60, %v689_v59  ;;  %v694_v4 = vld [vmem:[#allocation9 + $0x28] sm:$0xff]  ;;  %v695_v6 = vld [vmem:[#allocation9 + $0x30] sm:$0xff]  ;;  %v696_v7 = vld [vmem:[#allocation9 + $0x38] sm:$0xff] }
 0x196   :  { %2388 = vmatprep.subr.bf16.mxu1 %v2387_v10  ;;  %v2463_v8 = vpack.c.bf16 %v696_v7, %v695_v6  ;;  %v698_v11 = vld [vmem:[#allocation9 + $0x48] sm:$0xff]  ;;  %v700_v14 = vld [vmem:[#allocation9 + $0x58] sm:$0xff]  ;;  %v703_v18 = vld [vmem:[#allocation9 + $0x70] sm:$0xff] }
 0x197   :  { %v598_v21 = vld [vmem:[#allocation7] sm:$0xff]  ;;  %v866_v26 = vld [vmem:[#allocation12 + $0x10] sm:$0xff]  ;;  %v873_v37 = vld [vmem:[#allocation12 + $0x48] sm:$0xff] }
 0x198   :  { %v864_v24 = vld [vmem:[#allocation12] sm:$0xff]  ;;  %v870_v33 = vld [vmem:[#allocation12 + $0x30] sm:$0xff]  ;;  %v875_v40 = vld [vmem:[#allocation12 + $0x58] sm:$0xff] }
 0x199   :  { %2390 = vmatpush3.bf16.msra.mxu1 %v2387_v10  ;;  %v697_v10 = vld [vmem:[#allocation9 + $0x40] sm:$0xff]  ;;  %v877_v43 = vld [vmem:[#allocation12 + $0x68] sm:$0xff]  ;;  %v601_v46 = vld [vmem:[#allocation7 + $0x18] sm:$0xff] }
 0x19a   :  { %2392 = vmatprep.subr.bf16.mxu1 %v2391_v13  ;;  %v2467_v12 = vpack.c.bf16 %v698_v11, %v697_v10  ;;  %v868_v30 = vld [vmem:[#allocation12 + $0x20] sm:$0xff]  ;;  %v604_v53 = vld [vmem:[#allocation7 + $0x30] sm:$0xff]  ;;  %v879_v6 = vld [vmem:[#allocation12 + $0x78] sm:$0xff] }
 0x19b   :  { %v602_v50 = vld [vmem:[#allocation7 + $0x20] sm:$0xff]  ;;  %v608_v60 = vld [vmem:[#allocation7 + $0x50] sm:$0xff] }
 0x19d   :  { %2394 = vmatpush3.bf16.msra.mxu1 %v2391_v13  ;;  %v699_v13 = vld [vmem:[#allocation9 + $0x50] sm:$0xff] }
 0x19e   :  { %2396 = vmatprep.subr.bf16.mxu1 %v2395_v16  ;;  %v2471_v15 = vpack.c.bf16 %v700_v14, %v699_v13  ;;  %v3205_v14 = vmov 0.0|0.0  }
 0x1a1   :  { %2398 = vmatpush3.bf16.msra.mxu1 %v2395_v16  ;;  %v701_v16 = vld [vmem:[#allocation9 + $0x60] sm:$0xff] }
 0x1a2   :  { %2400 = vmatprep.subr.bf16.mxu1 %v2399_v19 }
 0x1a5   :  { %2402 = vmatpush3.bf16.msra.mxu1 %v2399_v19  ;;  %v704_v19 = vld [vmem:[#allocation9 + $0x78] sm:$0xff] }
 0x1a6   :  { %2404 = vmatprep.subr.bf16.mxu1 %v2403_v22  ;;  %v2479_v20 = vpack.c.bf16 %v704_v19, %v703_v18 }
 0x1a9   :  { %2406 = vmatpush3.bf16.msra.mxu1 %v2403_v22  ;;  %v599_v22 = vld [vmem:[#allocation7 + $0x8] sm:$0xff] }
 0x1aa   :  { %2408 = vmatprep.subr.bf16.mxu1 %v2407_v25  ;;  %v2483_v23 = vpack.c.bf16 %v599_v22, %v598_v21  ;;  %v1039_v21 = vld [vmem:[#allocation15] sm:$0xff]  ;;  %v1040_v22 = vld [vmem:[#allocation15 + $0x8] sm:$0xff] }
 0x1ad   :  { %2410 = vmatpush3.bf16.msra.mxu1 %v2407_v25  ;;  %v865_v25 = vld [vmem:[#allocation12 + $0x8] sm:$0xff] }
 0x1ae   :  { %2412 = vmatprep.subr.bf16.mxu1 %v2411_v28  ;;  %v2515_v27 = vpack.c.bf16 %v865_v25, %v864_v24  ;;  %v964_v24 = vld [vmem:[%s3870_s16] sm:$0xff]  ;;  %v2551_v25 = vpack.c.bf16 %v1040_v22, %v1039_v21  ;;  %v1235_v22 = vld [vmem:[#allocation19 + $0x40] sm:$0xff] }
 0x1b1   :  { %2414 = vmatpush3.bf16.msra.mxu1 %v2411_v28  ;;  %v867_v28 = vld [vmem:[#allocation12 + $0x18] sm:$0xff] }
 0x1b2   :  { %2416 = vmatprep.subr.bf16.mxu1 %v2415_v31  ;;  %v2519_v29 = vpack.c.bf16 %v867_v28, %v866_v26  ;;  %v1041_v26 = vld [vmem:[#allocation15 + $0x10] sm:$0xff] }
 0x267   :  { %v1944_v34 = vpop.f32.mrb[0].mxu1 }
 0x268   :  { %v414_v35 = vpop.f32.mrb[1].mxu1 }
 0x269   :  { %1977 = vmatprep.mubr.f32.mxu1 %v414_v35 }
 0x26a   :  { %1978 = vmatmul.mubr.f32.vlgmr.msra.gmra.mrb[2].mxu1 %v1944_v34  ;;  %v871_v34 = vld [vmem:[#allocation12 + $0x38] sm:$0xff] }
 0x26b   :  { %2418 = vmatpush3.bf16.msra.mxu1 %v2415_v31  ;;  %2012 = vmatprep.mubr.f32.mxu1 %v3644_v0  ;;  %v691_v0 = vld [vmem:[#allocation9 + $0x10] sm:$0xff]  ;;  %v2527_v35 = vpack.c.bf16 %v871_v34, %v870_v33  ;;  %v1046_v33 = vld [vmem:[#allocation15 + $0x38] sm:$0xff] }
 0x26c   :  { %2420 = vmatprep.subr.bf16.mxu1 %v2419_v36  ;;  %v2455_v3 = vpack.c.bf16 %v692_v2, %v691_v0  ;;  %v869_v31 = vld [vmem:[#allocation12 + $0x28] sm:$0xff]  ;;  %v610_v0 = vld [vmem:[#allocation7 + $0x60] sm:$0xff] }
 0x26d   :  { %v2523_v32 = vpack.c.bf16 %v869_v31, %v868_v30  ;;  %v611_v2 = vld [vmem:[#allocation7 + $0x68] sm:$0xff] }
 0x26e   :  { %v1044_v30 = vld [vmem:[#allocation15 + $0x28] sm:$0xff] }
 0x26f   :  { %2422 = vmatpush3.bf16.msra.mxu1 %v2419_v36  ;;  %v872_v36 = vld [vmem:[#allocation12 + $0x40] sm:$0xff] }
 0x270   :  { %2424 = vmatprep.subr.bf16.mxu1 %v2423_v39  ;;  %v2531_v38 = vpack.c.bf16 %v873_v37, %v872_v36  ;;  %v1048_v36 = vld [vmem:[#allocation15 + $0x48] sm:$0xff] }
 0x273   :  { %2426 = vmatpush3.bf16.msra.mxu1 %v2423_v39  ;;  %v874_v39 = vld [vmem:[#allocation12 + $0x50] sm:$0xff] }
 0x274   :  { %2428 = vmatprep.subr.bf16.mxu1 %v2427_v42  ;;  %v2535_v41 = vpack.c.bf16 %v875_v40, %v874_v39  ;;  %v1050_v39 = vld [vmem:[#allocation15 + $0x58] sm:$0xff] }
 0x277   :  { %2430 = vmatpush3.bf16.msra.mxu1 %v2427_v42  ;;  %v876_v42 = vld [vmem:[#allocation12 + $0x60] sm:$0xff] }
 0x278   :  { %2432 = vmatprep.subr.bf16.mxu1 %v2431_v45  ;;  %v2539_v44 = vpack.c.bf16 %v877_v43, %v876_v42  ;;  %v1052_v42 = vld [vmem:[#allocation15 + $0x68] sm:$0xff] }
 0x27b   :  { %2434 = vmatpush3.bf16.msra.mxu1 %v2431_v45  ;;  %v600_v45 = vld [vmem:[#allocation7 + $0x10] sm:$0xff] }
 0x27c   :  { %2436 = vmatprep.subr.bf16.mxu1 %v2435_v48  ;;  %v2487_v49 = vpack.c.bf16 %v601_v46, %v600_v45  ;;  %v1054_v45 = vld [vmem:[#allocation15 + $0x78] sm:$0xff] }
 0x27f   :  { %2438 = vmatpush3.bf16.msra.mxu1 %v2435_v48 }
 0x280   :  { %2440 = vmatprep.subr.bf16.mxu1 %v2439_v51 }
 0x283   :  { %2442 = vmatpush3.bf16.msra.mxu1 %v2439_v51  ;;  %v603_v51 = vld [vmem:[#allocation7 + $0x28] sm:$0xff] }
 0x284   :  { %2444 = vmatprep.subr.bf16.mxu1 %v2443_v54  ;;  %v2491_v52 = vpack.c.bf16 %v603_v51, %v602_v50  ;;  %v1135_v50 = vld [vmem:[%s3872_s10 + $0x10] sm:$0xff] }
 0x287   :  { %2446 = vmatpush3.bf16.msra.mxu1 %v2443_v54  ;;  %v605_v54 = vld [vmem:[#allocation7 + $0x38] sm:$0xff] }
 0x288   :  { %2516 = vmatprep.subr.bf16.mxu1 %v2515_v27 }
 0x28a   :  { %2013 = vmatmul.mubr.f32.vlgmr.msra.gmra.mrb[2].mxu1 %v3649_v1  ;;  %v693_v1 = vld [vmem:[#allocation9 + $0x20] sm:$0xff] }
 0x28b   :  { %v2459_v5 = vpack.c.bf16 %v694_v4, %v693_v1  ;;  %2518 = vmatpush3.bf16.msra.mxu1 %v2515_v27  ;;  %v613_v1 = vld [vmem:[#allocation7 + $0x78] sm:$0xff] }
 0x28c   :  { %2520 = vmatprep.subr.bf16.mxu1 %v2519_v29  ;;  %v1042_v27 = vld [vmem:[#allocation15 + $0x18] sm:$0xff] }
 0x28d   :  { %v2554_v28 = vpack.c.bf16 %v1042_v27, %v1041_v26  ;;  %v1238_v26 = vld [vmem:[#allocation19 + $0x58] sm:$0xff] }
 0x28f   :  { %2522 = vmatpush3.bf16.msra.mxu1 %v2519_v29  ;;  %v1043_v29 = vld [vmem:[#allocation15 + $0x20] sm:$0xff] }
 0x290   :  { %2524 = vmatprep.subr.bf16.mxu1 %v2523_v32  ;;  %v2557_v31 = vpack.c.bf16 %v1044_v30, %v1043_v29  ;;  %v1240_v29 = vld [vmem:[#allocation19 + $0x68] sm:$0xff] }
 0x293   :  { %2526 = vmatpush3.bf16.msra.mxu1 %v2523_v32  ;;  %v1045_v32 = vld [vmem:[#allocation15 + $0x30] sm:$0xff] }
 0x294   :  { %2528 = vmatprep.subr.bf16.mxu1 %v2527_v35  ;;  %v2560_v34 = vpack.c.bf16 %v1046_v33, %v1045_v32  ;;  %v1712_v33 = vld [vmem:[#allocation16] ss:$0 sm:$0xff] }
 0x297   :  { %2530 = vmatpush3.bf16.msra.mxu1 %v2527_v35  ;;  %v1047_v35 = vld [vmem:[#allocation15 + $0x40] sm:$0xff] }
 0x298   :  { %2532 = vmatprep.subr.bf16.mxu1 %v2531_v38  ;;  %v2563_v37 = vpack.c.bf16 %v1048_v36, %v1047_v35 }
 0x29b   :  { %2534 = vmatpush3.bf16.msra.mxu1 %v2531_v38  ;;  %v1049_v38 = vld [vmem:[#allocation15 + $0x50] sm:$0xff] }
 0x29c   :  { %2536 = vmatprep.subr.bf16.mxu1 %v2535_v41  ;;  %v2566_v40 = vpack.c.bf16 %v1050_v39, %v1049_v38  ;;  %v1241_v38 = vld [vmem:[#allocation19 + $0x70] sm:$0xff]  ;;  %v1242_v39 = vld [vmem:[#allocation19 + $0x78] sm:$0xff] }
 0x29f   :  { %2538 = vmatpush3.bf16.msra.mxu1 %v2535_v41  ;;  %v1051_v41 = vld [vmem:[#allocation15 + $0x60] sm:$0xff] }
 0x2a0   :  { %2540 = vmatprep.subr.bf16.mxu1 %v2539_v44  ;;  %v2569_v43 = vpack.c.bf16 %v1052_v42, %v1051_v41  ;;  %v1337_v41 = vld [vmem:[#allocation24] sm:$0xff]  ;;  %v1338_v42 = vld [vmem:[#allocation24 + $0x8] sm:$0xff] }
 0x2a3   :  { %2542 = vmatpush3.bf16.msra.mxu1 %v2539_v44  ;;  %v1053_v44 = vld [vmem:[#allocation15 + $0x70] sm:$0xff] }
 0x2a4   :  { %v2572_v46 = vpack.c.bf16 %v1054_v45, %v1053_v44  ;;  %v2623_v44 = vpack.c.bf16 %v1338_v42, %v1337_v41  ;;  %v1340_v45 = vld [vmem:[#allocation24 + $0x18] sm:$0xff] }
 0x2a5   :  { %v1504_v41 = vld [vmem:[#allocation27 + $0x10] sm:$0xff]  ;;  %v1505_v42 = vld [vmem:[#allocation27 + $0x18] sm:$0xff] }
 0x35d   :  { %v2014_v56 = vpop.f32.mrb[2].mxu1 }
 0x35e   :  { %v3667_v57 = vadd.f32 %v2014_v56, %v1706_v55  ;;  %v580_v58 = vpop.f32.mrb[3].mxu1  ;;  %v606_v56 = vld [vmem:[#allocation7 + $0x40] sm:$0xff] }
 0x35f   :  { %v3669_v61 = vadd.f32 %v1706_v55, %v580_v58  ;;  %v2495_v55 = vpack.c.bf16 %v605_v54, %v604_v53  ;;  %v607_v58 = vld [vmem:[#allocation7 + $0x48] sm:$0xff]  ;;  %v1137_v54 = vld [vmem:[%s3872_s10 + $0x20] sm:$0xff] }
 0x360   :  { %v2499_v59 = vpack.c.bf16 %v607_v58, %v606_v56  ;;  %v1139_v58 = vld [vmem:[%s3872_s10 + $0x30] sm:$0xff] }
 0x361   :  { %v2447_v62 = vpack.c.bf16 %v3667_v57, %v3669_v61 }
 0x363   :  { %2448 = vmatprep.subr.bf16.mxu0 %v2447_v62 }
 0x364   :  { %2450 = vmatpush3.bf16.msra.mxu0 %v2447_v62  ;;  %v609_v62 = vld [vmem:[#allocation7 + $0x58] sm:$0xff] }
 0x365   :  { %2452 = vmatprep.subr.bf16.mxu0 %v2451_v63 }
 0x367   :  { %2020 = vmatmul.mubr.msk.f32.vlgmr.msra.gmra.mrb[0].mxu0 %vm341_vm0, %v3661_v9  ;;  %v702_v9 = vld [vmem:[#allocation9 + $0x68] sm:$0xff] }
 0x368   :  { %2454 = vmatpush3.bf16.msra.mxu0 %v2451_v63  ;;  %v2475_v17 = vpack.c.bf16 %v702_v9, %v701_v16  ;;  %v2503_v63 = vpack.c.bf16 %v609_v62, %v608_v60  ;;  %v1141_v62 = vld [vmem:[%s3872_s10 + $0x40] sm:$0xff] }
 0x369   :  { %2456 = vmatprep.subr.bf16.mxu0 %v2455_v3 }
 0x36c   :  { %2458 = vmatpush3.bf16.msra.mxu0 %v2455_v3  ;;  %v612_v3 = vld [vmem:[#allocation7 + $0x70] sm:$0xff] }
 0x36d   :  { %2460 = vmatprep.subr.bf16.mxu0 %v2459_v5  ;;  %v2511_v4 = vpack.c.bf16 %v613_v1, %v612_v3  ;;  %v1145_v1 = vld [vmem:[%s3872_s10 + $0x60] sm:$0xff] }
 0x370   :  { %2462 = vmatpush3.bf16.msra.mxu0 %v2459_v5  ;;  %v878_v5 = vld [vmem:[#allocation12 + $0x70] sm:$0xff] }
 0x371   :  { %2464 = vmatprep.subr.bf16.mxu0 %v2463_v8  ;;  %v2543_v7 = vpack.c.bf16 %v879_v6, %v878_v5  ;;  %v1147_v6 = vld [vmem:[%s3872_s10 + $0x70] sm:$0xff] }
 0x373   :  { %2544 = vmatprep.subr.bf16.mxu1 %v2543_v7 }
 0x374   :  { %2466 = vmatpush3.bf16.msra.mxu0 %v2463_v8  ;;  %2546 = vmatpush3.bf16.msra.mxu1 %v2543_v7  ;;  %v1709_v8 = vld [vmem:[#allocation10] ss:$0 sm:$0xff]  ;;  %v1148_v7 = vld [vmem:[%s3872_s10 + $0x78] sm:$0xff] }
 0x375   :  { %2468 = vmatprep.subr.bf16.mxu0 %v2467_v12  ;;  %2574 = vmatprep.subr.bf16.mxu1 %v3205_v14 }
 0x378   :  { %2470 = vmatpush3.bf16.msra.mxu0 %v2467_v12 }
 0x379   :  { %2472 = vmatprep.subr.bf16.mxu0 %v2471_v15 }
 0x37c   :  { %2474 = vmatpush3.bf16.msra.mxu0 %v2471_v15  ;;  %v3207_v15 = vmov 0.0  }
 0x37d   :  { %2476 = vmatprep.subr.bf16.mxu0 %v2475_v17 }
 0x380   :  { %2478 = vmatpush3.bf16.msra.mxu0 %v2475_v17 }
 0x381   :  { %2480 = vmatprep.subr.bf16.mxu0 %v2479_v20 }
 0x384   :  { %2482 = vmatpush3.bf16.msra.mxu0 %v2479_v20 }
 0x385   :  { %2484 = vmatprep.subr.bf16.mxu0 %v2483_v23 }
 0x43a   :  { %v2021_v47 = vpop.f32.mrb[0].mxu0 }
 0x43b   :  { %v680_v48 = vpop.f32.mrb[1].mxu0 }
 0x43c   :  { %2054 = vmatprep.mubr.f32.mxu0 %v680_v48  ;;  %v1133_v48 = vld [vmem:[%s3872_s10] sm:$0xff] }
 0x43d   :  { %2055 = vmatmul.mubr.f32.vlgmr.msra.gmra.mrb[2].mxu0 %v2021_v47  ;;  %v1038_v47 = vld [vmem:[%s3871_s26] sm:$0xff] }
 0x43e   :  { %2486 = vmatpush3.bf16.msra.mxu0 %v2483_v23  ;;  %2089 = vmatprep.mubr.f32.mxu0 %v3669_v61  ;;  %v2507_v61 = vpack.c.bf16 %v611_v2, %v610_v0  ;;  %v1143_v2 = vld [vmem:[%s3872_s10 + $0x50] sm:$0xff] }
 0x43f   :  { %2488 = vmatprep.subr.bf16.mxu0 %v2487_v49 }
 0x442   :  { %2490 = vmatpush3.bf16.msra.mxu0 %v2487_v49  ;;  %v1134_v49 = vld [vmem:[%s3872_s10 + $0x8] sm:$0xff] }
 0x443   :  { %2492 = vmatprep.subr.bf16.mxu0 %v2491_v52  ;;  %v2575_v51 = vpack.c.bf16 %v1134_v49, %v1133_v48  ;;  %v1342_v48 = vld [vmem:[#allocation24 + $0x28] sm:$0xff] }
 0x446   :  { %2494 = vmatpush3.bf16.msra.mxu0 %v2491_v52  ;;  %v1136_v52 = vld [vmem:[%s3872_s10 + $0x18] sm:$0xff] }
 0x447   :  { %2496 = vmatprep.subr.bf16.mxu0 %v2495_v55  ;;  %v2578_v53 = vpack.c.bf16 %v1136_v52, %v1135_v50  ;;  %v1343_v50 = vld [vmem:[#allocation24 + $0x30] sm:$0xff] }
 0x44a   :  { %2498 = vmatpush3.bf16.msra.mxu0 %v2495_v55  ;;  %v1138_v55 = vld [vmem:[%s3872_s10 + $0x28] sm:$0xff] }
 0x44b   :  { %2500 = vmatprep.subr.bf16.mxu0 %v2499_v59  ;;  %v2581_v56 = vpack.c.bf16 %v1138_v55, %v1137_v54  ;;  %v1346_v54 = vld [vmem:[#allocation24 + $0x48] sm:$0xff] }
 0x44e   :  { %2502 = vmatpush3.bf16.msra.mxu0 %v2499_v59  ;;  %v1140_v59 = vld [vmem:[%s3872_s10 + $0x38] sm:$0xff] }
 0x44f   :  { %2504 = vmatprep.subr.bf16.mxu0 %v2503_v63  ;;  %v2584_v60 = vpack.c.bf16 %v1140_v59, %v1139_v58  ;;  %v1348_v58 = vld [vmem:[#allocation24 + $0x58] sm:$0xff] }
 0x452   :  { %2506 = vmatpush3.bf16.msra.mxu0 %v2503_v63  ;;  %v1142_v63 = vld [vmem:[%s3872_s10 + $0x48] sm:$0xff] }
 0x453   :  { %2508 = vmatprep.subr.bf16.mxu0 %v2507_v61  ;;  %v2587_v0 = vpack.c.bf16 %v1142_v63, %v1141_v62  ;;  %v1350_v62 = vld [vmem:[#allocation24 + $0x68] sm:$0xff] }
 0x456   :  { %2510 = vmatpush3.bf16.msra.mxu0 %v2507_v61  ;;  %v1144_v61 = vld [vmem:[%s3872_s10 + $0x58] sm:$0xff] }
 0x457   :  { %2512 = vmatprep.subr.bf16.mxu0 %v2511_v4  ;;  %v2590_v3 = vpack.c.bf16 %v1144_v61, %v1143_v2  ;;  %v1321_v2 = vld [vmem:[#allocation22] sm:$0xff]  ;;  %v1322_v61 = vld [vmem:[#allocation22 + $0x8] sm:$0xff] }
 0x45a   :  { %2514 = vmatpush3.bf16.msra.mxu0 %v2511_v4  ;;  %v1146_v4 = vld [vmem:[%s3872_s10 + $0x68] sm:$0xff] }
 0x45b   :  { %2547 = vmatprep.subr.bf16.mxu0 %v3205_v14  ;;  %v2593_v5 = vpack.c.bf16 %v1146_v4, %v1145_v1 }
 0x45d   :  { %2090 = vmatmul.mubr.f32.vlgmr.msra.gmra.mrb[2].mxu0 %v3667_v57  ;;  %v1710_v57 = vld [vmem:[#allocation13] ss:$0 sm:$0xff] }
 0x45e   :  { %2131 = vmatprep.mubr.msk.f32.mxu0 %vm3206_vm1, %v3207_v15 }
 0x530   :  { %v2091_v10 = vpop.f32.mrb[2].mxu0 }
 0x531   :  { %v846_v11 = vpop.f32.mrb[3].mxu0  ;;  %v863_v13 = vadd.f32 %v2091_v10, %v1709_v8  ;;  %v1227_v10 = vld [vmem:[#allocation19] sm:$0xff] }
 0x532   :  { %v862_v12 = vadd.f32 %v1709_v8, %v846_v11  ;;  %v2596_v8 = vpack.c.bf16 %v1148_v7, %v1147_v6  ;;  %v1228_v11 = vld [vmem:[#allocation19 + $0x8] sm:$0xff]  ;;  %v1323_v7 = vld [vmem:[#allocation22 + $0x10] sm:$0xff] }
 0x534   :  { %2124 = vmatprep.mubr.f32.mxu1 %v862_v12  ;;  %v1229_v12 = vld [vmem:[#allocation19 + $0x10] sm:$0xff] }
 0x535   :  { %2125 = vmatmul.mubr.f32.vlgmr.msra.gmra.mrb[4].mxu1 %v863_v13  ;;  %v2599_v13 = vpack.c.bf16 %v1228_v11, %v1227_v10  ;;  %v1325_v11 = vld [vmem:[#allocation22 + $0x20] sm:$0xff] }
 0x536   :  { %2201 = vmatprep.mubr.msk.f32.mxu1 %vm3206_vm1, %v3207_v15  ;;  %2576 = vmatpush3.bf16.msra.mxu1 %v2575_v51  ;;  %v1344_v51 = vld [vmem:[#allocation24 + $0x38] sm:$0xff] }
 0x537   :  { %2577 = vmatprep.subr.bf16.mxu1 %v3205_v14  ;;  %v2632_v52 = vpack.c.bf16 %v1344_v51, %v1343_v50  ;;  %v1511_v50 = vld [vmem:[#allocation27 + $0x48] sm:$0xff] }
 0x53a   :  { %2579 = vmatpush3.bf16.msra.mxu1 %v2578_v53  ;;  %v1345_v53 = vld [vmem:[#allocation24 + $0x40] sm:$0xff] }
 0x53b   :  { %2580 = vmatprep.subr.bf16.mxu1 %v3205_v14  ;;  %v2635_v55 = vpack.c.bf16 %v1346_v54, %v1345_v53 }
 0x53e   :  { %2582 = vmatpush3.bf16.msra.mxu1 %v2581_v56  ;;  %v1347_v56 = vld [vmem:[#allocation24 + $0x50] sm:$0xff] }
 0x53f   :  { %2583 = vmatprep.subr.bf16.mxu1 %v3205_v14  ;;  %v2638_v59 = vpack.c.bf16 %v1348_v58, %v1347_v56  ;;  %v1514_v56 = vld [vmem:[#allocation27 + $0x60] sm:$0xff]  ;;  %v1515_v58 = vld [vmem:[#allocation27 + $0x68] sm:$0xff] }
 0x542   :  { %2585 = vmatpush3.bf16.msra.mxu1 %v2584_v60  ;;  %v1349_v60 = vld [vmem:[#allocation24 + $0x60] sm:$0xff] }
 0x543   :  { %2586 = vmatprep.subr.bf16.mxu1 %v3205_v14  ;;  %v2641_v63 = vpack.c.bf16 %v1350_v62, %v1349_v60  ;;  %v1516_v60 = vld [vmem:[#allocation27 + $0x70] sm:$0xff]  ;;  %v1517_v62 = vld [vmem:[#allocation27 + $0x78] sm:$0xff] }
 0x546   :  { %2588 = vmatpush3.bf16.msra.mxu1 %v2587_v0  ;;  %v1713_v0 = vld [vmem:[#allocation18] ss:$0 sm:$0xff] }
 0x547   :  { %2589 = vmatprep.subr.bf16.mxu1 %v3205_v14 }
 0x54a   :  { %2591 = vmatpush3.bf16.msra.mxu1 %v2590_v3 }
 0x54b   :  { %2592 = vmatprep.subr.bf16.mxu1 %v3205_v14 }
 0x54e   :  { %2594 = vmatpush3.bf16.msra.mxu1 %v2593_v5  ;;  %v2647_v5 = vpack.c.bf16 %v1322_v61, %v1321_v2  ;;  %v1597_v2 = vld [vmem:[#allocation30 + $0x8] sm:$0xff]  ;;  %v1598_v61 = vld [vmem:[#allocation30 + $0x10] sm:$0xff] }
 0x54f   :  { %2595 = vmatprep.subr.bf16.mxu1 %v3205_v14 }
 0x552   :  { %2597 = vmatpush3.bf16.msra.mxu1 %v2596_v8  ;;  %v1324_v8 = vld [vmem:[#allocation22 + $0x18] sm:$0xff] }
 0x553   :  { %2622 = vmatprep.subr.bf16.mxu1 %v3205_v14  ;;  %v2650_v10 = vpack.c.bf16 %v1324_v8, %v1323_v7  ;;  %v1602_v8 = vld [vmem:[#allocation30 + $0x30] sm:$0xff] }
 0x608   :  { %v2126_v16 = vpop.f32.mrb[4].mxu1 }
 0x609   :  { %v959_v9 = vadd.f32 %v2126_v16, %v1710_v57  ;;  %v953_v17 = vpop.f32.mrb[5].mxu1 }
 0x60a   :  { %v954_v18 = vadd.f32 %v1710_v57, %v953_v17  ;;  %v1230_v57 = vld [vmem:[#allocation19 + $0x18] sm:$0xff]  ;;  %v1232_v17 = vld [vmem:[#allocation19 + $0x28] sm:$0xff] }
 0x60b   :  { %v963_v19 = vmax.f32 %v959_v9, 0.0  ;;  %v2602_v16 = vpack.c.bf16 %v1230_v57, %v1229_v12  ;;  %v1231_v9 = vld [vmem:[#allocation19 + $0x20] sm:$0xff]  ;;  %v1326_v12 = vld [vmem:[#allocation22 + $0x28] sm:$0xff]  ;;  %v1327_v57 = vld [vmem:[#allocation22 + $0x30] sm:$0xff] }
 0x60c   :  { %v962_v20 = vmax.f32 %v954_v18, 0.0  ;;  %v2605_v18 = vpack.c.bf16 %v1232_v17, %v1231_v9  ;;  %v1329_v17 = vld [vmem:[#allocation22 + $0x40] sm:$0xff] }
 0x60e   :  { %v2548_v23 = vpack.c.bf16 %v963_v19, %v962_v20  ;;  %v1233_v19 = vld [vmem:[#allocation19 + $0x30] sm:$0xff]  ;;  %v1234_v20 = vld [vmem:[#allocation19 + $0x38] sm:$0xff] }
 0x60f   :  { %v2608_v21 = vpack.c.bf16 %v1234_v20, %v1233_v19  ;;  %v1331_v20 = vld [vmem:[#allocation22 + $0x50] sm:$0xff] }
 0x610   :  { %2549 = vmatpush3.bf16.msra.mxu0 %v2548_v23  ;;  %v1236_v23 = vld [vmem:[#allocation19 + $0x48] sm:$0xff] }
 0x611   :  { %2550 = vmatprep.subr.bf16.mxu0 %v3205_v14 }
 0x613   :  { %2132 = vmatmul.mubr.msk.f32.vlgmr.msra.gmra.mrb[4].mxu0 %vm341_vm0, %v964_v24  ;;  %v2611_v24 = vpack.c.bf16 %v1236_v23, %v1235_v22  ;;  %v1333_v23 = vld [vmem:[#allocation22 + $0x60] sm:$0xff] }
 0x614   :  { %2552 = vmatpush3.bf16.msra.mxu0 %v2551_v25  ;;  %2166 = vmatprep.mubr.msk.f32.mxu0 %vm3206_vm1, %v3207_v15  ;;  %v1237_v25 = vld [vmem:[#allocation19 + $0x50] sm:$0xff] }
 0x615   :  { %2553 = vmatprep.subr.bf16.mxu0 %v3205_v14  ;;  %v2614_v27 = vpack.c.bf16 %v1238_v26, %v1237_v25  ;;  %v1335_v26 = vld [vmem:[#allocation22 + $0x70] sm:$0xff] }
 0x618   :  { %2555 = vmatpush3.bf16.msra.mxu0 %v2554_v28  ;;  %v1239_v28 = vld [vmem:[#allocation19 + $0x60] sm:$0xff] }
 0x619   :  { %2556 = vmatprep.subr.bf16.mxu0 %v3205_v14  ;;  %v2617_v30 = vpack.c.bf16 %v1240_v29, %v1239_v28  ;;  %v1351_v29 = vld [vmem:[#allocation24 + $0x70] sm:$0xff] }
 0x61c   :  { %2558 = vmatpush3.bf16.msra.mxu0 %v2557_v31 }
 0x61d   :  { %2559 = vmatprep.subr.bf16.mxu0 %v3205_v14 }
 0x620   :  { %2561 = vmatpush3.bf16.msra.mxu0 %v2560_v34 }
 0x621   :  { %2562 = vmatprep.subr.bf16.mxu0 %v3205_v14 }
 0x624   :  { %2564 = vmatpush3.bf16.msra.mxu0 %v2563_v37 }
 0x625   :  { %2565 = vmatprep.subr.bf16.mxu0 %v3205_v14 }
 0x628   :  { %2567 = vmatpush3.bf16.msra.mxu0 %v2566_v40  ;;  %v2620_v40 = vpack.c.bf16 %v1242_v39, %v1241_v38 }
 0x629   :  { %2568 = vmatprep.subr.bf16.mxu0 %v3205_v14 }
 0x62c   :  { %2570 = vmatpush3.bf16.msra.mxu0 %v2569_v43  ;;  %v1339_v43 = vld [vmem:[#allocation24 + $0x10] sm:$0xff] }
 0x62d   :  { %2571 = vmatprep.subr.bf16.mxu0 %v3205_v14 }
 0x630   :  { %2573 = vmatpush3.bf16.msra.mxu0 %v2572_v46  ;;  %v2626_v46 = vpack.c.bf16 %v1340_v45, %v1339_v43  ;;  %v1506_v43 = vld [vmem:[#allocation27 + $0x20] sm:$0xff] }
 0x631   :  { %2598 = vmatprep.subr.bf16.mxu0 %v3205_v14 }
 0x633   :  { %2167 = vmatmul.mubr.f32.vlgmr.msra.gmra.mrb[6].mxu0 %v1038_v47  ;;  %v1341_v47 = vld [vmem:[#allocation24 + $0x20] sm:$0xff] }
 0x634   :  { %2236 = vmatprep.mubr.msk.f32.mxu0 %vm3206_vm1, %v3207_v15  ;;  %2600 = vmatpush3.bf16.msra.mxu0 %v2599_v13  ;;  %v2629_v49 = vpack.c.bf16 %v1342_v48, %v1341_v47  ;;  %v2653_v13 = vpack.c.bf16 %v1326_v12, %v1325_v11  ;;  %v1509_v47 = vld [vmem:[#allocation27 + $0x38] sm:$0xff]  ;;  %v1604_v12 = vld [vmem:[#allocation30 + $0x40] sm:$0xff] }
 0x635   :  { %2601 = vmatprep.subr.bf16.mxu0 %v3205_v14 }
 0x638   :  { %2603 = vmatpush3.bf16.msra.mxu0 %v2602_v16  ;;  %v1328_v16 = vld [vmem:[#allocation22 + $0x38] sm:$0xff] }
 0x639   :  { %2604 = vmatprep.subr.bf16.mxu0 %v3205_v14  ;;  %v2656_v9 = vpack.c.bf16 %v1328_v16, %v1327_v57  ;;  %v1606_v16 = vld [vmem:[#allocation30 + $0x50] sm:$0xff] }
 0x63c   :  { %2606 = vmatpush3.bf16.msra.mxu0 %v2605_v18  ;;  %v1330_v18 = vld [vmem:[#allocation22 + $0x48] sm:$0xff] }
 0x63d   :  { %2607 = vmatprep.subr.bf16.mxu0 %v3205_v14  ;;  %v2659_v19 = vpack.c.bf16 %v1330_v18, %v1329_v17  ;;  %v1608_v18 = vld [vmem:[#allocation30 + $0x60] sm:$0xff] }
 0x640   :  { %2609 = vmatpush3.bf16.msra.mxu0 %v2608_v21  ;;  %v1332_v21 = vld [vmem:[#allocation22 + $0x58] sm:$0xff] }
 0x641   :  { %2610 = vmatprep.subr.bf16.mxu0 %v3205_v14  ;;  %v2662_v22 = vpack.c.bf16 %v1332_v21, %v1331_v20 }
 0x644   :  { %2612 = vmatpush3.bf16.msra.mxu0 %v2611_v24  ;;  %v1334_v24 = vld [vmem:[#allocation22 + $0x68] sm:$0xff] }
 0x645   :  { %2613 = vmatprep.subr.bf16.mxu0 %v3205_v14  ;;  %v2665_v25 = vpack.c.bf16 %v1334_v24, %v1333_v23 }
 0x648   :  { %2615 = vmatpush3.bf16.msra.mxu0 %v2614_v27  ;;  %v1336_v27 = vld [vmem:[#allocation22 + $0x78] sm:$0xff] }
 0x649   :  { %2616 = vmatprep.subr.bf16.mxu0 %v3205_v14  ;;  %v2668_v28 = vpack.c.bf16 %v1336_v27, %v1335_v26  ;;  %v1610_v27 = vld [vmem:[#allocation30 + $0x70] sm:$0xff] }
 0x64c   :  { %2618 = vmatpush3.bf16.msra.mxu0 %v2617_v30  ;;  %v1352_v30 = vld [vmem:[#allocation24 + $0x78] sm:$0xff] }
 0x64d   :  { %2619 = vmatprep.subr.bf16.mxu0 %v3205_v14 }
 0x650   :  { %2621 = vmatpush3.bf16.msra.mxu0 %v2620_v40 }
 0x651   :  { %2646 = vmatprep.subr.bf16.mxu0 %v3205_v14 }
 0x6e6   :  { %v3766_v31 = vpop.f32.mrb[4].mxu0 }
 0x6e7   :  { %v2133_v32 = vpop.f32.mrb[5].mxu0 }
 0x6e8   :  { %v2644_v32 = vpack.c.bf16 %v1352_v30, %v1351_v29  ;;  %v1716_v30 = vld [vmem:[#allocation28] ss:$0 sm:$0xff] }
 0x706   :  { %v1128_v34 = vpop.f32.mrb[6].mxu0 }
 0x707   :  { %v1129_v35 = vadd.f32 %v1712_v33, %v1128_v34  ;;  %v2168_v36 = vpop.f32.mrb[7].mxu0  ;;  %v1714_v33 = vld [vmem:[#allocation21] ss:$0 sm:$0xff]  ;;  %v1502_v34 = vld [vmem:[#allocation27] sm:$0xff] }
 0x709   :  { %v1132_v37 = vmax.f32 %v1129_v35, 0.0  ;;  %v1503_v35 = vld [vmem:[#allocation27 + $0x8] sm:$0xff] }
 0x70a   :  { %v2671_v39 = vpack.c.bf16 %v1503_v35, %v1502_v34 }
 0x70b   :  { %2202 = vmatmul.mubr.f32.vlgmr.msra.gmra.mrb[6].mxu1 %v1132_v37 }
 0x70c   :  { %2271 = vmatprep.mubr.msk.f32.mxu1 %vm3206_vm1, %v3207_v15  ;;  %2624 = vmatpush3.bf16.msra.mxu1 %v2623_v44  ;;  %v1507_v44 = vld [vmem:[#allocation27 + $0x28] sm:$0xff] }
 0x70d   :  { %2625 = vmatprep.subr.bf16.mxu1 %v3205_v14  ;;  %v2677_v45 = vpack.c.bf16 %v1507_v44, %v1506_v43 }
 0x710   :  { %2627 = vmatpush3.bf16.msra.mxu1 %v2626_v46  ;;  %v1508_v46 = vld [vmem:[#allocation27 + $0x30] sm:$0xff] }
 0x711   :  { %2628 = vmatprep.subr.bf16.mxu1 %v3205_v14  ;;  %v2680_v48 = vpack.c.bf16 %v1509_v47, %v1508_v46 }
 0x714   :  { %2630 = vmatpush3.bf16.msra.mxu1 %v2629_v49  ;;  %v1510_v49 = vld [vmem:[#allocation27 + $0x40] sm:$0xff] }
 0x715   :  { %2631 = vmatprep.subr.bf16.mxu1 %v3205_v14  ;;  %v2683_v51 = vpack.c.bf16 %v1511_v50, %v1510_v49 }
 0x718   :  { %2633 = vmatpush3.bf16.msra.mxu1 %v2632_v52  ;;  %v1513_v52 = vld [vmem:[#allocation27 + $0x58] sm:$0xff] }
 0x719   :  { %2634 = vmatprep.subr.bf16.mxu1 %v3205_v14 }
 0x71c   :  { %2636 = vmatpush3.bf16.msra.mxu1 %v2635_v55 }
 0x71d   :  { %2637 = vmatprep.subr.bf16.mxu1 %v3205_v14 }
 0x720   :  { %2639 = vmatpush3.bf16.msra.mxu1 %v2638_v59  ;;  %v2689_v59 = vpack.c.bf16 %v1515_v58, %v1514_v56 }
 0x721   :  { %2640 = vmatprep.subr.bf16.mxu1 %v3205_v14 }
 0x724   :  { %2642 = vmatpush3.bf16.msra.mxu1 %v2641_v63  ;;  %v2692_v63 = vpack.c.bf16 %v1517_v62, %v1516_v60 }
 0x725   :  { %2643 = vmatprep.subr.bf16.mxu1 %v3205_v14 }
 0x728   :  { %2645 = vmatpush3.bf16.msra.mxu1 %v2644_v32 }
 0x729   :  { %2670 = vmatprep.subr.bf16.mxu1 %v3205_v14 }
 0x7de   :  { %v1222_v3 = vpop.f32.mrb[6].mxu1 }
 0x7df   :  { %v1223_v1 = vadd.f32 %v1713_v0, %v1222_v3  ;;  %v2203_v4 = vpop.f32.mrb[7].mxu1  ;;  %v1596_v0 = vld [vmem:[#allocation30] sm:$0xff] }
 0x7e0   :  { %v2695_v3 = vpack.c.bf16 %v1597_v2, %v1596_v0 }
 0x7e1   :  { %v1226_v6 = vmax.f32 %v1223_v1, 0.0  ;;  %v1599_v1 = vld [vmem:[#allocation30 + $0x18] sm:$0xff] }
 0x7e2   :  { %v2698_v4 = vpack.c.bf16 %v1599_v1, %v1598_v61 }
 0x7e3   :  { %2237 = vmatmul.mubr.f32.vlgmr.msra.gmra.mrb[8].mxu0 %v1226_v6  ;;  %v1601_v6 = vld [vmem:[#allocation30 + $0x28] sm:$0xff] }
 0x7e4   :  { %2648 = vmatpush3.bf16.msra.mxu0 %v2647_v5  ;;  %2306 = vmatprep.mubr.msk.f32.mxu0 %vm3206_vm1, %v3207_v15  ;;  %v1600_v5 = vld [vmem:[#allocation30 + $0x20] sm:$0xff] }
 0x7e5   :  { %2649 = vmatprep.subr.bf16.mxu0 %v3205_v14  ;;  %v2701_v7 = vpack.c.bf16 %v1601_v6, %v1600_v5 }
 0x7e8   :  { %2651 = vmatpush3.bf16.msra.mxu0 %v2650_v10  ;;  %v1603_v10 = vld [vmem:[#allocation30 + $0x38] sm:$0xff] }
 0x7e9   :  { %2652 = vmatprep.subr.bf16.mxu0 %v3205_v14  ;;  %v2704_v11 = vpack.c.bf16 %v1603_v10, %v1602_v8 }
 0x7ec   :  { %2654 = vmatpush3.bf16.msra.mxu0 %v2653_v13  ;;  %v1605_v13 = vld [vmem:[#allocation30 + $0x48] sm:$0xff] }
 0x7ed   :  { %2655 = vmatprep.subr.bf16.mxu0 %v3205_v14  ;;  %v2707_v57 = vpack.c.bf16 %v1605_v13, %v1604_v12 }
 0x7f0   :  { %2657 = vmatpush3.bf16.msra.mxu0 %v2656_v9  ;;  %v1607_v9 = vld [vmem:[#allocation30 + $0x58] sm:$0xff] }
 0x7f1   :  { %2658 = vmatprep.subr.bf16.mxu0 %v3205_v14  ;;  %v2710_v17 = vpack.c.bf16 %v1607_v9, %v1606_v16 }
 0x7f4   :  { %2660 = vmatpush3.bf16.msra.mxu0 %v2659_v19  ;;  %v1609_v19 = vld [vmem:[#allocation30 + $0x68] sm:$0xff] }
 0x7f5   :  { %2661 = vmatprep.subr.bf16.mxu0 %v3205_v14  ;;  %v2713_v20 = vpack.c.bf16 %v1609_v19, %v1608_v18 }
 0x7f8   :  { %2663 = vmatpush3.bf16.msra.mxu0 %v2662_v22  ;;  %v1715_v22 = vld [vmem:[#allocation25] ss:$0 sm:$0xff] }
 0x7f9   :  { %2664 = vmatprep.subr.bf16.mxu0 %v3205_v14 }
 0x7fc   :  { %2666 = vmatpush3.bf16.msra.mxu0 %v2665_v25 }
 0x7fd   :  { %2667 = vmatprep.subr.bf16.mxu0 %v3205_v14 }
 0x800   :  { %2669 = vmatpush3.bf16.msra.mxu0 %v2668_v28  ;;  %v1611_v28 = vld [vmem:[#allocation30 + $0x78] sm:$0xff] }
 0x801   :  { %2694 = vmatprep.subr.bf16.mxu0 %v3205_v14  ;;  %v2716_v29 = vpack.c.bf16 %v1611_v28, %v1610_v27 }
 0x803   :  { %2307 = vmatmul.mubr.f32.vlgmr.msra.gmra.mrb[10].mxu0 %v3766_v31  ;;  %v2674_v31 = vpack.c.bf16 %v1505_v42, %v1504_v41 }
 0x804   :  { %2376 = vmatprep.mubr.msk.f32.mxu0 %vm3206_vm1, %v3207_v15  ;;  %2696 = vmatpush3.bf16.msra.mxu0 %v2695_v3 }
 0x805   :  { %2697 = vmatprep.subr.bf16.mxu0 %v3205_v14 }
 0x808   :  { %2699 = vmatpush3.bf16.msra.mxu0 %v2698_v4 }
 0x809   :  { %2700 = vmatprep.subr.bf16.mxu0 %v3205_v14 }
 0x80c   :  { %2702 = vmatpush3.bf16.msra.mxu0 %v2701_v7 }
 0x80d   :  { %2703 = vmatprep.subr.bf16.mxu0 %v3205_v14 }
 0x810   :  { %2705 = vmatpush3.bf16.msra.mxu0 %v2704_v11 }
 0x811   :  { %2706 = vmatprep.subr.bf16.mxu0 %v3205_v14 }
 0x814   :  { %2708 = vmatpush3.bf16.msra.mxu0 %v2707_v57 }
 0x815   :  { %2709 = vmatprep.subr.bf16.mxu0 %v3205_v14 }
 0x818   :  { %2711 = vmatpush3.bf16.msra.mxu0 %v2710_v17 }
 0x819   :  { %2712 = vmatprep.subr.bf16.mxu0 %v3205_v14 }
 0x81c   :  { %2714 = vmatpush3.bf16.msra.mxu0 %v2713_v20 }
 0x81d   :  { %2715 = vmatprep.subr.bf16.mxu0 %v3205_v14 }
 0x820   :  { %2717 = vmatpush3.bf16.msra.mxu0 %v2716_v29 }
 0x8b6   :  { %v1316_v36 = vpop.f32.mrb[8].mxu0 }
 0x8b7   :  { %v1317_v37 = vadd.f32 %v1714_v33, %v1316_v36  ;;  %v2238_v38 = vpop.f32.mrb[9].mxu0 }
 0x8b9   :  { %v1320_v40 = vmax.f32 %v1317_v37, 0.0 }
 0x8bb   :  { %2272 = vmatmul.mubr.f32.vlgmr.msra.gmra.mrb[8].mxu1 %v1320_v40 }
 0x8bc   :  { %2672 = vmatpush3.bf16.msra.mxu1 %v2671_v39  ;;  %2341 = vmatprep.mubr.msk.f32.mxu1 %vm3206_vm1, %v3207_v15  ;;  %v1512_v15 = vld [vmem:[#allocation27 + $0x50] sm:$0xff] }
 0x8bd   :  { %2673 = vmatprep.subr.bf16.mxu1 %v3205_v14  ;;  %v2686_v53 = vpack.c.bf16 %v1513_v52, %v1512_v15 }
 0x8c0   :  { %2675 = vmatpush3.bf16.msra.mxu1 %v2674_v31 }
 0x8c1   :  { %2676 = vmatprep.subr.bf16.mxu1 %v3205_v14 }
 0x8c4   :  { %2678 = vmatpush3.bf16.msra.mxu1 %v2677_v45 }
 0x8c5   :  { %2679 = vmatprep.subr.bf16.mxu1 %v3205_v14 }
 0x8c8   :  { %2681 = vmatpush3.bf16.msra.mxu1 %v2680_v48 }
 0x8c9   :  { %2682 = vmatprep.subr.bf16.mxu1 %v3205_v14 }
 0x8cc   :  { %2684 = vmatpush3.bf16.msra.mxu1 %v2683_v51 }
 0x8cd   :  { %2685 = vmatprep.subr.bf16.mxu1 %v3205_v14 }
 0x8d0   :  { %2687 = vmatpush3.bf16.msra.mxu1 %v2686_v53 }
 0x8d1   :  { %2688 = vmatprep.subr.bf16.mxu1 %v3205_v14 }
 0x8d4   :  { %2690 = vmatpush3.bf16.msra.mxu1 %v2689_v59 }
 0x8d5   :  { %2691 = vmatprep.subr.bf16.mxu1 %v3205_v14  ;;  %v1717_v14 = vld [vmem:[%s3873_s15] ss:$0 sm:$0xff] }
 0x8d6   :  { %v1489_v54 = vpop.f32.mrb[10].mxu0 }
 0x8d7   :  { %v2308_v55 = vpop.f32.mrb[11].mxu0 }
 0x8d8   :  { %2693 = vmatpush3.bf16.msra.mxu1 %v2692_v63 }
 0x98e   :  { %v1419_v21 = vpop.f32.mrb[8].mxu1 }
 0x98f   :  { %v1490_v23 = vadd.f32 %v1489_v54, %v1419_v21  ;;  %v2273_v24 = vpop.f32.mrb[9].mxu1 }
 0x991   :  { %v1500_v25 = vadd.f32 %v1715_v22, %v1490_v23 }
 0x993   :  { %v1501_v26 = vmax.f32 %v1500_v25, 0.0 }
 0x995   :  { %2342 = vmatmul.mubr.f32.vlgmr.msra.gmra.mrb[10].mxu1 %v1501_v26 }
 0xa68   :  { %v1591_v32 = vpop.f32.mrb[10].mxu1 }
 0xa69   :  { %v1592_v33 = vadd.f32 %v1716_v30, %v1591_v32  ;;  %v2343_v34 = vpop.f32.mrb[11].mxu1 }
 0xa6b   :  { %v1595_v35 = vmax.f32 %v1592_v33, 0.0 }
 0xa6d   :  { %2377 = vmatmul.mubr.f32.vlgmr.msra.gmra.mrb[12].mxu0 %v1595_v35 }
 0xb40   :  { %v1685_v36 = vpop.f32.mrb[12].mxu0 }
 0xb41   :  { %v1686_v37 = vadd.f32 %v1717_v14, %v1685_v36  ;;  %v2378_v38 = vpop.f32.mrb[13].mxu0 }
 0xb43   :  { %1689 = vst [vmem:[%s3874_s24] sm:$0xff] %v1686_v37 }
 0xb44   :  { %1694 = vsyncpa [#allocation3], 1 }
 0xb45   :  { %1695 = vsyncpa [#allocation5], 1 }
 0xb46   :  { %1696 = vsyncpa [#allocation8], 1 }
 0xb47   :  { %1697 = vsyncpa [#allocation11], 1 }
 0xb48   :  { %1698 = vsyncpa [#allocation14], 1 }
 0xb49   :  { %1699 = vsyncpa [#allocation17], 1 }
 0xb4a   :  { %1700 = vsyncpa [#allocation20], 1 }
 0xb4b   :  { %1701 = vsyncpa [#allocation23], 1 }
 0xb4c   :  { %1702 = vsyncpa [#allocation26], 1 }
 0xb4d   :  { %1703 = vsyncpa [#allocation29], 1 }

</bundles_post_ra>
